<compile_context>
chip_gen: v5e
topology: v5e:2x2
jax: 0.10.0
libtpu: 0.0.40
codegen_flags: <defaults>
</compile_context>

<pallas_src>
import functools

import jax
import jax.numpy as jnp
from jax import lax
from jax.experimental import pallas as pl
from jax.experimental.pallas import tpu as pltpu


_VMEM_LIMIT = 32 * 1024 * 1024  # safe on v5e (16M default) / v6e / v7x (32M default)


def _round_up(x, m):
    return (x + m - 1) // m * m


def _pick_tile(pp, candidates=(512, 384, 256, 128)):
    """Largest lane-aligned pixel tile that divides the padded pixel count."""
    for t in candidates:
        if pp % t == 0:
            return t
    return 128


def _pad_last(a, pp):
    p = a.shape[-1]
    if p == pp:
        return a
    pad = [(0, 0)] * (a.ndim - 1) + [(0, pp - p)]
    return jnp.pad(a, pad)


# ---------------------------------------------------------------------------
# Kernel 1: fused `down` 1x1x1 conv + commuted `out` 1x1x1 conv (bias deferred).
# x tile: [C, TM] (pixels on lanes).  Two MXU dots from the same x tile.
# ---------------------------------------------------------------------------
def _dual_conv1x1_kernel(x_ref, wd_ref, bd_ref, wo_ref, od_ref, oo_ref):
    x = x_ref[...]
    accd = jnp.dot(wd_ref[...], x, preferred_element_type=jnp.float32)
    od_ref[...] = (accd + bd_ref[...].astype(jnp.float32)).astype(od_ref.dtype)
    acco = jnp.dot(wo_ref[...], x, preferred_element_type=jnp.float32)
    oo_ref[...] = acco.astype(oo_ref.dtype)


def dual_conv1x1_pixels_last(x_cf, w_down, b_down, w_out, *, tile_p,
                             mxu_dtype=None, out_dtype=jnp.float32):
    """x_cf: [C, Pp]; w_down: [cd, C]; b_down: [cd]; w_out: [c2, C]."""
    C, Pp = x_cf.shape
    cd = w_down.shape[0]
    c2 = w_out.shape[0]
    if mxu_dtype is not None:
        x_cf = x_cf.astype(mxu_dtype)
        w_down = w_down.astype(mxu_dtype)
        w_out = w_out.astype(mxu_dtype)
    xd, xo = pl.pallas_call(
        _dual_conv1x1_kernel,
        out_shape=(jax.ShapeDtypeStruct((cd, Pp), out_dtype),
                   jax.ShapeDtypeStruct((c2, Pp), out_dtype)),
        grid_spec=pltpu.PrefetchScalarGridSpec(
            num_scalar_prefetch=0,
            grid=(Pp // tile_p,),
            in_specs=[
                pl.BlockSpec((C, tile_p), lambda i: (0, i)),
                pl.BlockSpec((cd, C), lambda i: (0, 0)),
                pl.BlockSpec((cd, 1), lambda i: (0, 0)),
                pl.BlockSpec((c2, C), lambda i: (0, 0)),
            ],
            out_specs=[pl.BlockSpec((cd, tile_p), lambda i: (0, i)),
                       pl.BlockSpec((c2, tile_p), lambda i: (0, i))],
        ),
        compiler_params=pltpu.CompilerParams(
            dimension_semantics=("parallel",),
            vmem_limit_bytes=_VMEM_LIMIT),
    )(x_cf, w_down, b_down.reshape(cd, 1).astype(jnp.float32), w_out)
    return xd, xo


# ---------------------------------------------------------------------------
# Kernel 2: matmul + bias, pixels-last (used for the encoder k^3 conv im2col).
# w: [M, K] resident, x tile: [K, TM], out tile: [M, TM]  (bias added in f32).
# ---------------------------------------------------------------------------
def _matmul_bias_kernel(x_ref, w_ref, b_ref, o_ref):
    acc = jnp.dot(w_ref[...], x_ref[...], preferred_element_type=jnp.float32)
    o_ref[...] = (acc + b_ref[...].astype(jnp.float32)).astype(o_ref.dtype)


def matmul_bias_pixels_last(w, x, b, *, tile_p, mxu_dtype=None,
                            out_dtype=jnp.float32):
    """w: [M, K], x: [K, Pp], b: [M]  ->  [M, Pp]."""
    M, K = w.shape
    Kx, Pp = x.shape
    assert K == Kx
    if mxu_dtype is not None:
        w = w.astype(mxu_dtype)
        x = x.astype(mxu_dtype)
    return pl.pallas_call(
        _matmul_bias_kernel,
        out_shape=jax.ShapeDtypeStruct((M, Pp), out_dtype),
        grid_spec=pltpu.PrefetchScalarGridSpec(
            num_scalar_prefetch=0,
            grid=(Pp // tile_p,),
            in_specs=[
                pl.BlockSpec((K, tile_p), lambda i: (0, i)),
                pl.BlockSpec((M, K), lambda i: (0, 0)),
                pl.BlockSpec((M, 1), lambda i: (0, 0)),
            ],
            out_specs=pl.BlockSpec((M, tile_p), lambda i: (0, i)),
        ),
        compiler_params=pltpu.CompilerParams(
            dimension_semantics=("parallel",),
            vmem_limit_bytes=_VMEM_LIMIT),
    )(x, w, b.reshape(M, 1).astype(jnp.float32))


# ---------------------------------------------------------------------------
# Kernel 3: fused softmax(k^3) + CARAFE reassembly + deferred out-conv bias.
#   xo_ref: [K3, C,  TM]   unfolded (out-conv'd) features, pixels on lanes
#   lg_ref: [K3, U3, TM]   encoder logits, (k^3-major, up^3-minor)
#   b_ref : [C, 1, 1]      out-conv bias
#   o_ref : [C, U3, TM]
#   e_ref : VMEM scratch [K3, U3, TM] f32 (only used when channel-chunking)
# ---------------------------------------------------------------------------
def _carafe_kernel(xo_ref, lg_ref, b_ref, o_ref, e_ref, *, c_chunk):
    K3, C, TM = xo_ref.shape
    U3 = lg_ref.shape[1]
    f32 = jnp.float32

    # softmax max over the leading K3 axis: elementwise maxes of [U3, TM] slabs.
    m = lg_ref[0].astype(f32)
    for kk in range(1, K3):
        m = jnp.maximum(m, lg_ref[kk].astype(f32))

    denom = jnp.zeros((U3, TM), f32)
    if c_chunk >= C:
        # Single pass: exp / denom / unrolled K3 FMA contraction together.
        acc = jnp.zeros((C, U3, TM), f32)
        for kk in range(K3):
            e_k = jnp.exp(lg_ref[kk].astype(f32) - m)
            denom = denom + e_k
            acc = acc + xo_ref[kk].astype(f32)[:, None, :] * e_k[None, :, :]
        inv = pl.reciprocal(denom, approx=True)      # EUP; frees VALU slots
        o_ref[...] = (acc * inv[None, :, :]
                      + b_ref[...].astype(f32)).astype(o_ref.dtype)
    else:
        # Large C: stage exp(logits) in VMEM once, then chunk channels so the
        # accumulator stays inside the vreg file (no spills).
        for kk in range(K3):
            e_k = jnp.exp(lg_ref[kk].astype(f32) - m)
            e_ref[kk] = e_k
            denom = denom + e_k
        inv = pl.reciprocal(denom, approx=True)
        for c0 in range(0, C, c_chunk):
            cb = min(c_chunk, C - c0)
            acc = jnp.zeros((cb, U3, TM), f32)
            for kk in range(K3):
                xk = xo_ref[kk, c0:c0 + cb, :].astype(f32)
                acc = acc + xk[:, None, :] * e_ref[kk][None, :, :]
            acc = acc * inv[None, :, :] + b_ref[c0:c0 + cb].astype(f32)
            o_ref[c0:c0 + cb, :, :] = acc.astype(o_ref.dtype)


def carafe_reassembly(xo_unf, lgT, b_out, *, tile_p, out_dtype=jnp.float32):
    """xo_unf: [K3, C, Pp], lgT: [K3, U3, Pp], b_out: [C]  ->  [C, U3, Pp]."""
    K3, C, Pp = xo_unf.shape
    _, U3, _ = lgT.shape
    # Keep the per-chunk accumulator <= ~16 vregs (64 KiB).
    c_chunk = max(1, min(C, (16 * 4096) // max(1, U3 * tile_p * 4)))
    kern = functools.partial(_carafe_kernel, c_chunk=c_chunk)
    return pl.pallas_call(
        kern,
        out_shape=jax.ShapeDtypeStruct((C, U3, Pp), out_dtype),
        grid_spec=pltpu.PrefetchScalarGridSpec(
            num_scalar_prefetch=0,
            grid=(Pp // tile_p,),
            in_specs=[
                pl.BlockSpec((K3, C, tile_p), lambda i: (0, 0, i)),
                pl.BlockSpec((K3, U3, tile_p), lambda i: (0, 0, i)),
                pl.BlockSpec((C, 1, 1), lambda i: (0, 0, 0)),
            ],
            out_specs=pl.BlockSpec((C, U3, tile_p), lambda i: (0, 0, i)),
            scratch_shapes=[pltpu.VMEM((K3, U3, tile_p), jnp.float32)],
        ),
        compiler_params=pltpu.CompilerParams(
            dimension_semantics=("parallel",),
            vmem_limit_bytes=_VMEM_LIMIT),
    )(xo_unf, lgT, b_out.reshape(C, 1, 1).astype(jnp.float32))


# ---------------------------------------------------------------------------
# Glue (plain JAX): 3-D unfold (im2col) in pixels-last layouts, params, forward.
# ---------------------------------------------------------------------------
# TODO(synk): fuse this unfold into the Pallas kernels with halo'd spatial
# tiles + manual DMA; it is the remaining 27x HBM materialization.
def _unfold_pixels_last(vol, k, *, tap_axis):
    """vol: [C, N, H, W, D] -> taps stacked along `tap_axis`, pixels-last.
       tap_axis=0 -> [k^3, C, P]   (reassembly layout)
       tap_axis=1 -> [C*k^3, P]    (im2col layout, channel-major, tap-minor)"""
    C, N, H, W, D = vol.shape
    p = k // 2
    vp = jnp.pad(vol, ((0, 0), (0, 0), (p, p), (p, p), (p, p)))
    cols = [vp[:, :, i:i + H, j:j + W, l:l + D]
            for i in range(k) for j in range(k) for l in range(k)]
    pat = jnp.stack(cols, axis=tap_axis)
    P = N * H * W * D
    if tap_axis == 0:
        return pat.reshape(k ** 3, C, P)
    return pat.reshape(C * k ** 3, P)


def _unfold3d_channels_last(x, k):
    """(reference only) x: [N, C, H, W, D] -> [N, H, W, D, C, k^3]."""
    p = k // 2
    N, C, H, W, D = x.shape
    xp = jnp.pad(x, ((0, 0), (0, 0), (p, p), (p, p), (p, p)))
    cols = [xp[:, :, i:i + H, j:j + W, l:l + D]
            for i in range(k) for j in range(k) for l in range(k)]
    patches = jnp.stack(cols, axis=-1)                   # [N, C, H, W, D, k^3]
    return jnp.transpose(patches, (0, 2, 3, 4, 1, 5))


def init_params(key, c1, c2, k, up):
    cd = c1 // 4
    ke_out = (up ** 3) * (k ** 3)
    kd, ke, ko = jax.random.split(key, 3)
    return dict(
        # torch layouts: Conv3d 1x1 weight as [out, in]; encoder [out, in, k, k, k]
        w_down=jax.random.normal(kd, (cd, c1), jnp.float32) * 0.2,
        b_down=jnp.linspace(-0.1, 0.1, cd, dtype=jnp.float32),
        w_enc=jax.random.normal(ke, (ke_out, cd, k, k, k), jnp.float32) * 0.2,
        b_enc=jnp.linspace(-0.05, 0.05, ke_out, dtype=jnp.float32),
        w_out=jax.random.normal(ko, (c2, c1), jnp.float32) * 0.2,
        b_out=jnp.linspace(-0.1, 0.1, c2, dtype=jnp.float32),
    )


def carafe3d_forward(x, params, *, k=3, up=2, mxu_dtype=None):
    """x: [N, c1, H, W, D] -> [N, c2, H*up, W*up, D*up]."""
    N, C, H, W, D = x.shape
    cd = params['w_down'].shape[0]
    c2 = params['w_out'].shape[0]
    K3, U3 = k ** 3, up ** 3
    P = N * H * W * D
    Pp = _round_up(P, 128)
    tile_mm = _pick_tile(Pp)                       # 1x1 convs / encoder matmul
    tile_re = 256 if Pp % 256 == 0 else 128        # reassembly (vreg-friendly)

    # channel-first, pixels-last [C, P] view of x (single input transpose).
    x_cf = _pad_last(jnp.transpose(x, (1, 0, 2, 3, 4)).reshape(C, P), Pp)

    # ---- fused `down` (1x1x1) + commuted `out` (1x1x1, bias deferred) ----
    xd, xo = dual_conv1x1_pixels_last(
        x_cf, params['w_down'], params['b_down'], params['w_out'],
        tile_p=tile_mm, mxu_dtype=mxu_dtype)

    # ---- encoder: k^3 conv as im2col (channel-major taps) @ W_enc ----
    xd_vol = xd[:, :P].reshape(cd, N, H, W, D)
    patches = _pad_last(_unfold_pixels_last(xd_vol, k, tap_axis=1), Pp)
    w_enc2 = params['w_enc'].reshape(K3 * U3, cd * K3)
    lgT = matmul_bias_pixels_last(w_enc2, patches, params['b_enc'],
                                  tile_p=tile_mm, mxu_dtype=mxu_dtype)
    # encoder channels are (k^3-major, up^3-minor): pixel shuffle of the
    # kernel tensor + unfold(step=up) is a pure reshape here.
    lgT = lgT.reshape(K3, U3, Pp)

    # ---- CARAFE reassembly on the commuted out-conv features ----
    xo_vol = xo[:, :P].reshape(c2, N, H, W, D)
    xo_unf = _pad_last(_unfold_pixels_last(xo_vol, k, tap_axis=0), Pp)
    y = carafe_reassembly(xo_unf, lgT, params['b_out'], tile_p=tile_re)

    # ---- pixel_shuffle_3d back to the NCHWD output layout ----
    # TODO(synk): fold this permutation into the reassembly out BlockSpec
    # (strided scatter) to drop the final wrapper transpose.
    y = y[:, :, :P].reshape(c2, up, up, up, N, H, W, D)
    y = jnp.transpose(y, (4, 0, 5, 1, 6, 2, 7, 3))
    return y.reshape(N, c2, H * up, W * up, D * up)


# ---------------------------------------------------------------------------
# Pure-JAX reference (lax.conv based) for a numerical self-check.
# ---------------------------------------------------------------------------
def carafe3d_reference(x, params, *, k=3, up=2):
    N, C, H, W, D = x.shape
    K3, U3 = k ** 3, up ** 3
    p = k // 2
    xd = jnp.einsum('nchwd,mc->nmhwd', x, params['w_down']) \
        + params['b_down'][None, :, None, None, None]
    w_enc = params['w_enc']
    dn = lax.conv_dimension_numbers(xd.shape, w_enc.shape,
                                    ('NCDHW', 'OIDHW', 'NCDHW'))
    enc = lax.conv_general_dilated(xd, w_enc, (1, 1, 1), [(p, p)] * 3,
                                   dimension_numbers=dn)
    enc = enc + params['b_enc'][None, :, None, None, None]
    kt = jax.nn.softmax(enc.reshape(N, K3, U3, H, W, D), axis=1)
    kt = jnp.transpose(kt, (0, 3, 4, 5, 1, 2))                    # [N,H,W,D,K3,U3]
    xu = _unfold3d_channels_last(x, k)                            # [N,H,W,D,C,K3]
    out = jnp.einsum('nhwdck,nhwdku->nhwdcu', xu, kt)
    out = out.reshape(N, H, W, D, C, up, up, up)
    out = jnp.transpose(out, (0, 4, 1, 5, 2, 6, 3, 7)).reshape(
        N, C, H * up, W * up, D * up)
    y = jnp.einsum('nchwd,mc->nmhwd', out, params['w_out']) \
        + params['b_out'][None, :, None, None, None]
    return y


if __name__ == "__main__":
    key = jax.random.PRNGKey(0)
    kx, kp = jax.random.split(key)
    N, c1, c2 = 2, 4, 4
    H = W = D = 4
    k, up = 3, 2

    x = jax.random.normal(kx, (N, c1, H, W, D), jnp.float32)
    params = init_params(kp, c1, c2, k, up)

    fwd = jax.jit(functools.partial(carafe3d_forward, k=k, up=up))
    y = jax.block_until_ready(fwd(x, params))
    assert y.shape == (N, c2, H * up, W * up, D * up), y.shape

    y_ref = carafe3d_reference(x, params, k=k, up=up)
    err = float(jnp.max(jnp.abs(y - y_ref)))
    assert err < 2e-3, f"mismatch vs JAX reference: {err}"

    # bf16-MXU perf path (v5e/v6e/v7x): compile + finiteness smoke test.
    fwd_bf16 = jax.jit(functools.partial(carafe3d_forward, k=k, up=up,
                                         mxu_dtype=jnp.bfloat16))
    y_bf16 = jax.block_until_ready(fwd_bf16(x, params))
    assert bool(jnp.all(jnp.isfinite(y_bf16)))

    print("KERNEL_OK")
</pallas_src>

<mosaic_0001>
module attributes {stable_mosaic.version = 11 : i64} {
  func.func @_dual_conv1x1_kernel(%arg0: i32, %arg1: memref<4x128xf32, #tpu.memory_space<vmem>>, %arg2: memref<1x4xf32, #tpu.memory_space<vmem>>, %arg3: memref<1x1xf32, #tpu.memory_space<vmem>>, %arg4: memref<4x4xf32, #tpu.memory_space<vmem>>, %arg5: memref<1x128xf32, #tpu.memory_space<vmem>>, %arg6: memref<4x128xf32, #tpu.memory_space<vmem>>) attributes {dimension_semantics = [#tpu.dimension_semantics<parallel>], iteration_bounds = array<i64: 1>, scalar_prefetch = 0 : i64, scratch_operands = 0 : i64, tpu.core_type = #tpu.core_type<tc>, window_params = [{transform_indices = @transform_0, window_bounds = array<i64: 4, 128>}, {pipeline_mode = #tpu.pipeline_mode<synchronous>, transform_indices = @transform_1, window_bounds = array<i64: 1, 4>}, {pipeline_mode = #tpu.pipeline_mode<synchronous>, transform_indices = @transform_2, window_bounds = array<i64: 1, 1>}, {pipeline_mode = #tpu.pipeline_mode<synchronous>, transform_indices = @transform_3, window_bounds = array<i64: 4, 4>}, {transform_indices = @transform_4, window_bounds = array<i64: 1, 128>}, {transform_indices = @transform_5, window_bounds = array<i64: 4, 128>}]} {
    %c0 = arith.constant 0 : index
    %c0_0 = arith.constant 0 : index
    %0 = vector.load %arg1[%c0, %c0_0] : memref<4x128xf32, #tpu.memory_space<vmem>>, vector<4x128xf32>
    %c0_1 = arith.constant 0 : index
    %c0_2 = arith.constant 0 : index
    %1 = vector.load %arg2[%c0_1, %c0_2] : memref<1x4xf32, #tpu.memory_space<vmem>>, vector<1x4xf32>
    %cst = arith.constant dense<0.000000e+00> : vector<1x128xf32>
    %2 = tpu.matmul %1, %0, %cst {dimension_numbers = #tpu.dot_dimension_numbers<[1], [0], [0], [1], [0, 0, 1, 1], [], []>} : vector<1x4xf32>, vector<4x128xf32>, vector<1x128xf32> -> vector<1x128xf32>
    %c0_3 = arith.constant 0 : index
    %c0_4 = arith.constant 0 : index
    %3 = vector.load %arg3[%c0_3, %c0_4] : memref<1x1xf32, #tpu.memory_space<vmem>>, vector<1x1xf32>
    %4 = vector.broadcast %3 : vector<1x1xf32> to vector<1x128xf32>
    %5 = arith.addf %2, %4 : vector<1x128xf32>
    %c0_5 = arith.constant 0 : index
    %c0_6 = arith.constant 0 : index
    %6 = vector.load %arg5[%c0_5, %c0_6] : memref<1x128xf32, #tpu.memory_space<vmem>>, vector<1x128xf32>
    tpu.vector_store %arg5[%c0_5, %c0_6], %5 {strides = array<i32>} : memref<1x128xf32, #tpu.memory_space<vmem>>, vector<1x128xf32>,
    %c0_7 = arith.constant 0 : index
    %c0_8 = arith.constant 0 : index
    %7 = vector.load %arg4[%c0_7, %c0_8] : memref<4x4xf32, #tpu.memory_space<vmem>>, vector<4x4xf32>
    %cst_9 = arith.constant dense<0.000000e+00> : vector<4x128xf32>
    %8 = tpu.matmul %7, %0, %cst_9 {dimension_numbers = #tpu.dot_dimension_numbers<[1], [0], [0], [1], [0, 0, 1, 1], [], []>} : vector<4x4xf32>, vector<4x128xf32>, vector<4x128xf32> -> vector<4x128xf32>
    %c0_10 = arith.constant 0 : index
    %c0_11 = arith.constant 0 : index
    %9 = vector.load %arg6[%c0_10, %c0_11] : memref<4x128xf32, #tpu.memory_space<vmem>>, vector<4x128xf32>
    tpu.vector_store %arg6[%c0_10, %c0_11], %8 {strides = array<i32>} : memref<4x128xf32, #tpu.memory_space<vmem>>, vector<4x128xf32>,
    return
  }
  func.func @transform_0(%arg0: i32) -> (i32, i32) {
    %c0_i32 = arith.constant 0 : i32
    %c0_i32_0 = arith.constant 0 : i32
    return %c0_i32, %arg0 : i32, i32
  }
  func.func @transform_1(%arg0: i32) -> (i32, i32) {
    %c0_i32 = arith.constant 0 : i32
    %c0_i32_0 = arith.constant 0 : i32
    %c0_i32_1 = arith.constant 0 : i32
    return %c0_i32, %c0_i32_0 : i32, i32
  }
  func.func @transform_2(%arg0: i32) -> (i32, i32) {
    %c0_i32 = arith.constant 0 : i32
    %c0_i32_0 = arith.constant 0 : i32
    %c0_i32_1 = arith.constant 0 : i32
    return %c0_i32, %c0_i32_0 : i32, i32
  }
  func.func @transform_3(%arg0: i32) -> (i32, i32) {
    %c0_i32 = arith.constant 0 : i32
    %c0_i32_0 = arith.constant 0 : i32
    %c0_i32_1 = arith.constant 0 : i32
    return %c0_i32, %c0_i32_0 : i32, i32
  }
  func.func @transform_4(%arg0: i32) -> (i32, i32) {
    %c0_i32 = arith.constant 0 : i32
    %c0_i32_0 = arith.constant 0 : i32
    return %c0_i32, %arg0 : i32, i32
  }
  func.func @transform_5(%arg0: i32) -> (i32, i32) {
    %c0_i32 = arith.constant 0 : i32
    %c0_i32_0 = arith.constant 0 : i32
    return %c0_i32, %arg0 : i32, i32
  }
}

module attributes {stable_mosaic.version = 11 : i64} {
  func.func @_matmul_bias_kernel(%arg0: i32, %arg1: memref<27x128xf32, #tpu.memory_space<vmem>>, %arg2: memref<216x27xf32, #tpu.memory_space<vmem>>, %arg3: memref<216x1xf32, #tpu.memory_space<vmem>>, %arg4: memref<216x128xf32, #tpu.memory_space<vmem>>) attributes {dimension_semantics = [#tpu.dimension_semantics<parallel>], iteration_bounds = array<i64: 1>, scalar_prefetch = 0 : i64, scratch_operands = 0 : i64, tpu.core_type = #tpu.core_type<tc>, window_params = [{transform_indices = @transform_0, window_bounds = array<i64: 27, 128>}, {pipeline_mode = #tpu.pipeline_mode<synchronous>, transform_indices = @transform_1, window_bounds = array<i64: 216, 27>}, {pipeline_mode = #tpu.pipeline_mode<synchronous>, transform_indices = @transform_2, window_bounds = array<i64: 216, 1>}, {transform_indices = @transform_3, window_bounds = array<i64: 216, 128>}]} {
    %c0 = arith.constant 0 : index
    %c0_0 = arith.constant 0 : index
    %0 = vector.load %arg2[%c0, %c0_0] : memref<216x27xf32, #tpu.memory_space<vmem>>, vector<216x27xf32>
    %c0_1 = arith.constant 0 : index
    %c0_2 = arith.constant 0 : index
    %1 = vector.load %arg1[%c0_1, %c0_2] : memref<27x128xf32, #tpu.memory_space<vmem>>, vector<27x128xf32>
    %cst = arith.constant dense<0.000000e+00> : vector<216x128xf32>
    %2 = tpu.matmul %0, %1, %cst {dimension_numbers = #tpu.dot_dimension_numbers<[1], [0], [0], [1], [0, 0, 1, 1], [], []>} : vector<216x27xf32>, vector<27x128xf32>, vector<216x128xf32> -> vector<216x128xf32>
    %c0_3 = arith.constant 0 : index
    %c0_4 = arith.constant 0 : index
    %3 = vector.load %arg3[%c0_3, %c0_4] : memref<216x1xf32, #tpu.memory_space<vmem>>, vector<216x1xf32>
    %4 = vector.broadcast %3 : vector<216x1xf32> to vector<216x128xf32>
    %5 = arith.addf %2, %4 : vector<216x128xf32>
    %c0_5 = arith.constant 0 : index
    %c0_6 = arith.constant 0 : index
    %6 = vector.load %arg4[%c0_5, %c0_6] : memref<216x128xf32, #tpu.memory_space<vmem>>, vector<216x128xf32>
    tpu.vector_store %arg4[%c0_5, %c0_6], %5 {strides = array<i32>} : memref<216x128xf32, #tpu.memory_space<vmem>>, vector<216x128xf32>,
    return
  }
  func.func @transform_0(%arg0: i32) -> (i32, i32) {
    %c0_i32 = arith.constant 0 : i32
    %c0_i32_0 = arith.constant 0 : i32
    return %c0_i32, %arg0 : i32, i32
  }
  func.func @transform_1(%arg0: i32) -> (i32, i32) {
    %c0_i32 = arith.constant 0 : i32
    %c0_i32_0 = arith.constant 0 : i32
    %c0_i32_1 = arith.constant 0 : i32
    return %c0_i32, %c0_i32_0 : i32, i32
  }
  func.func @transform_2(%arg0: i32) -> (i32, i32) {
    %c0_i32 = arith.constant 0 : i32
    %c0_i32_0 = arith.constant 0 : i32
    %c0_i32_1 = arith.constant 0 : i32
    return %c0_i32, %c0_i32_0 : i32, i32
  }
  func.func @transform_3(%arg0: i32) -> (i32, i32) {
    %c0_i32 = arith.constant 0 : i32
    %c0_i32_0 = arith.constant 0 : i32
    return %c0_i32, %arg0 : i32, i32
  }
}

module attributes {stable_mosaic.version = 11 : i64} {
  func.func @_carafe_kernel(%arg0: i32, %arg1: memref<27x4x128xf32, #tpu.memory_space<vmem>>, %arg2: memref<27x8x128xf32, #tpu.memory_space<vmem>>, %arg3: memref<4x1x1xf32, #tpu.memory_space<vmem>>, %arg4: memref<4x8x128xf32, #tpu.memory_space<vmem>>, %arg5: memref<27x8x128xf32, #tpu.memory_space<vmem>>) attributes {dimension_semantics = [#tpu.dimension_semantics<parallel>], iteration_bounds = array<i64: 1>, scalar_prefetch = 0 : i64, scratch_operands = 1 : i64, tpu.core_type = #tpu.core_type<tc>, window_params = [{transform_indices = @transform_0, window_bounds = array<i64: 27, 4, 128>}, {transform_indices = @transform_1, window_bounds = array<i64: 27, 8, 128>}, {pipeline_mode = #tpu.pipeline_mode<synchronous>, transform_indices = @transform_2, window_bounds = array<i64: 4, 1, 1>}, {transform_indices = @transform_3, window_bounds = array<i64: 4, 8, 128>}]} {
    %c0 = arith.constant 0 : index
    %c0_0 = arith.constant 0 : index
    %c0_1 = arith.constant 0 : index
    %0 = vector.load %arg2[%c0, %c0_0, %c0_1] : memref<27x8x128xf32, #tpu.memory_space<vmem>>, vector<1x8x128xf32>
    %1 = vector.shape_cast %0 : vector<1x8x128xf32> to vector<8x128xf32>
    %c1 = arith.constant 1 : index
    %c0_2 = arith.constant 0 : index
    %c0_3 = arith.constant 0 : index
    %2 = vector.load %arg2[%c1, %c0_2, %c0_3] : memref<27x8x128xf32, #tpu.memory_space<vmem>>, vector<1x8x128xf32>
    %3 = vector.shape_cast %2 : vector<1x8x128xf32> to vector<8x128xf32>
    %4 = arith.maximumf %1, %3 : vector<8x128xf32>
    %c2 = arith.constant 2 : index
    %c0_4 = arith.constant 0 : index
    %c0_5 = arith.constant 0 : index
    %5 = vector.load %arg2[%c2, %c0_4, %c0_5] : memref<27x8x128xf32, #tpu.memory_space<vmem>>, vector<1x8x128xf32>
    %6 = vector.shape_cast %5 : vector<1x8x128xf32> to vector<8x128xf32>
    %7 = arith.maximumf %4, %6 : vector<8x128xf32>
    %c3 = arith.constant 3 : index
    %c0_6 = arith.constant 0 : index
    %c0_7 = arith.constant 0 : index
    %8 = vector.load %arg2[%c3, %c0_6, %c0_7] : memref<27x8x128xf32, #tpu.memory_space<vmem>>, vector<1x8x128xf32>
    %9 = vector.shape_cast %8 : vector<1x8x128xf32> to vector<8x128xf32>
    %10 = arith.maximumf %7, %9 : vector<8x128xf32>
    %c4 = arith.constant 4 : index
    %c0_8 = arith.constant 0 : index
    %c0_9 = arith.constant 0 : index
    %11 = vector.load %arg2[%c4, %c0_8, %c0_9] : memref<27x8x128xf32, #tpu.memory_space<vmem>>, vector<1x8x128xf32>
    %12 = vector.shape_cast %11 : vector<1x8x128xf32> to vector<8x128xf32>
    %13 = arith.maximumf %10, %12 : vector<8x128xf32>
    %c5 = arith.constant 5 : index
    %c0_10 = arith.constant 0 : index
    %c0_11 = arith.constant 0 : index
    %14 = vector.load %arg2[%c5, %c0_10, %c0_11] : memref<27x8x128xf32, #tpu.memory_space<vmem>>, vector<1x8x128xf32>
    %15 = vector.shape_cast %14 : vector<1x8x128xf32> to vector<8x128xf32>
    %16 = arith.maximumf %13, %15 : vector<8x128xf32>
    %c6 = arith.constant 6 : index
    %c0_12 = arith.constant 0 : index
    %c0_13 = arith.constant 0 : index
    %17 = vector.load %arg2[%c6, %c0_12, %c0_13] : memref<27x8x128xf32, #tpu.memory_space<vmem>>, vector<1x8x128xf32>
    %18 = vector.shape_cast %17 : vector<1x8x128xf32> to vector<8x128xf32>
    %19 = arith.maximumf %16, %18 : vector<8x128xf32>
    %c7 = arith.constant 7 : index
    %c0_14 = arith.constant 0 : index
    %c0_15 = arith.constant 0 : index
    %20 = vector.load %arg2[%c7, %c0_14, %c0_15] : memref<27x8x128xf32, #tpu.memory_space<vmem>>, vector<1x8x128xf32>
    %21 = vector.shape_cast %20 : vector<1x8x128xf32> to vector<8x128xf32>
    %22 = arith.maximumf %19, %21 : vector<8x128xf32>
    %c8 = arith.constant 8 : index
    %c0_16 = arith.constant 0 : index
    %c0_17 = arith.constant 0 : index
    %23 = vector.load %arg2[%c8, %c0_16, %c0_17] : memref<27x8x128xf32, #tpu.memory_space<vmem>>, vector<1x8x128xf32>
    %24 = vector.shape_cast %23 : vector<1x8x128xf32> to vector<8x128xf32>
    %25 = arith.maximumf %22, %24 : vector<8x128xf32>
    %c9 = arith.constant 9 : index
    %c0_18 = arith.constant 0 : index
    %c0_19 = arith.constant 0 : index
    %26 = vector.load %arg2[%c9, %c0_18, %c0_19] : memref<27x8x128xf32, #tpu.memory_space<vmem>>, vector<1x8x128xf32>
    %27 = vector.shape_cast %26 : vector<1x8x128xf32> to vector<8x128xf32>
    %28 = arith.maximumf %25, %27 : vector<8x128xf32>
    %c10 = arith.constant 10 : index
    %c0_20 = arith.constant 0 : index
    %c0_21 = arith.constant 0 : index
    %29 = vector.load %arg2[%c10, %c0_20, %c0_21] : memref<27x8x128xf32, #tpu.memory_space<vmem>>, vector<1x8x128xf32>
    %30 = vector.shape_cast %29 : vector<1x8x128xf32> to vector<8x128xf32>
    %31 = arith.maximumf %28, %30 : vector<8x128xf32>
    %c11 = arith.constant 11 : index
    %c0_22 = arith.constant 0 : index
    %c0_23 = arith.constant 0 : index
    %32 = vector.load %arg2[%c11, %c0_22, %c0_23] : memref<27x8x128xf32, #tpu.memory_space<vmem>>, vector<1x8x128xf32>
    %33 = vector.shape_cast %32 : vector<1x8x128xf32> to vector<8x128xf32>
    %34 = arith.maximumf %31, %33 : vector<8x128xf32>
    %c12 = arith.constant 12 : index
    %c0_24 = arith.constant 0 : index
    %c0_25 = arith.constant 0 : index
    %35 = vector.load %arg2[%c12, %c0_24, %c0_25] : memref<27x8x128xf32, #tpu.memory_space<vmem>>, vector<1x8x128xf32>
    %36 = vector.shape_cast %35 : vector<1x8x128xf32> to vector<8x128xf32>
    %37 = arith.maximumf %34, %36 : vector<8x128xf32>
    %c13 = arith.constant 13 : index
    %c0_26 = arith.constant 0 : index
    %c0_27 = arith.constant 0 : index
    %38 = vector.load %arg2[%c13, %c0_26, %c0_27] : memref<27x8x128xf32, #tpu.memory_space<vmem>>, vector<1x8x128xf32>
    %39 = vector.shape_cast %38 : vector<1x8x128xf32> to vector<8x128xf32>
    %40 = arith.maximumf %37, %39 : vector<8x128xf32>
    %c14 = arith.constant 14 : index
    %c0_28 = arith.constant 0 : index
    %c0_29 = arith.constant 0 : index
    %41 = vector.load %arg2[%c14, %c0_28, %c0_29] : memref<27x8x128xf32, #tpu.memory_space<vmem>>, vector<1x8x128xf32>
    %42 = vector.shape_cast %41 : vector<1x8x128xf32> to vector<8x128xf32>
    %43 = arith.maximumf %40, %42 : vector<8x128xf32>
    %c15 = arith.constant 15 : index
    %c0_30 = arith.constant 0 : index
    %c0_31 = arith.constant 0 : index
    %44 = vector.load %arg2[%c15, %c0_30, %c0_31] : memref<27x8x128xf32, #tpu.memory_space<vmem>>, vector<1x8x128xf32>
    %45 = vector.shape_cast %44 : vector<1x8x128xf32> to vector<8x128xf32>
    %46 = arith.maximumf %43, %45 : vector<8x128xf32>
    %c16 = arith.constant 16 : index
    %c0_32 = arith.constant 0 : index
    %c0_33 = arith.constant 0 : index
    %47 = vector.load %arg2[%c16, %c0_32, %c0_33] : memref<27x8x128xf32, #tpu.memory_space<vmem>>, vector<1x8x128xf32>
    %48 = vector.shape_cast %47 : vector<1x8x128xf32> to vector<8x128xf32>
    %49 = arith.maximumf %46, %48 : vector<8x128xf32>
    %c17 = arith.constant 17 : index
    %c0_34 = arith.constant 0 : index
    %c0_35 = arith.constant 0 : index
    %50 = vector.load %arg2[%c17, %c0_34, %c0_35] : memref<27x8x128xf32, #tpu.memory_space<vmem>>, vector<1x8x128xf32>
    %51 = vector.shape_cast %50 : vector<1x8x128xf32> to vector<8x128xf32>
    %52 = arith.maximumf %49, %51 : vector<8x128xf32>
    %c18 = arith.constant 18 : index
    %c0_36 = arith.constant 0 : index
    %c0_37 = arith.constant 0 : index
    %53 = vector.load %arg2[%c18, %c0_36, %c0_37] : memref<27x8x128xf32, #tpu.memory_space<vmem>>, vector<1x8x128xf32>
    %54 = vector.shape_cast %53 : vector<1x8x128xf32> to vector<8x128xf32>
    %55 = arith.maximumf %52, %54 : vector<8x128xf32>
    %c19 = arith.constant 19 : index
    %c0_38 = arith.constant 0 : index
    %c0_39 = arith.constant 0 : index
    %56 = vector.load %arg2[%c19, %c0_38, %c0_39] : memref<27x8x128xf32, #tpu.memory_space<vmem>>, vector<1x8x128xf32>
    %57 = vector.shape_cast %56 : vector<1x8x128xf32> to vector<8x128xf32>
    %58 = arith.maximumf %55, %57 : vector<8x128xf32>
    %c20 = arith.constant 20 : index
    %c0_40 = arith.constant 0 : index
    %c0_41 = arith.constant 0 : index
    %59 = vector.load %arg2[%c20, %c0_40, %c0_41] : memref<27x8x128xf32, #tpu.memory_space<vmem>>, vector<1x8x128xf32>
    %60 = vector.shape_cast %59 : vector<1x8x128xf32> to vector<8x128xf32>
    %61 = arith.maximumf %58, %60 : vector<8x128xf32>
    %c21 = arith.constant 21 : index
    %c0_42 = arith.constant 0 : index
    %c0_43 = arith.constant 0 : index
    %62 = vector.load %arg2[%c21, %c0_42, %c0_43] : memref<27x8x128xf32, #tpu.memory_space<vmem>>, vector<1x8x128xf32>
    %63 = vector.shape_cast %62 : vector<1x8x128xf32> to vector<8x128xf32>
    %64 = arith.maximumf %61, %63 : vector<8x128xf32>
    %c22 = arith.constant 22 : index
    %c0_44 = arith.constant 0 : index
    %c0_45 = arith.constant 0 : index
    %65 = vector.load %arg2[%c22, %c0_44, %c0_45] : memref<27x8x128xf32, #tpu.memory_space<vmem>>, vector<1x8x128xf32>
    %66 = vector.shape_cast %65 : vector<1x8x128xf32> to vector<8x128xf32>
    %67 = arith.maximumf %64, %66 : vector<8x128xf32>
    %c23 = arith.constant 23 : index
    %c0_46 = arith.constant 0 : index
    %c0_47 = arith.constant 0 : index
    %68 = vector.load %arg2[%c23, %c0_46, %c0_47] : memref<27x8x128xf32, #tpu.memory_space<vmem>>, vector<1x8x128xf32>
    %69 = vector.shape_cast %68 : vector<1x8x128xf32> to vector<8x128xf32>
    %70 = arith.maximumf %67, %69 : vector<8x128xf32>
    %c24 = arith.constant 24 : index
    %c0_48 = arith.constant 0 : index
    %c0_49 = arith.constant 0 : index
    %71 = vector.load %arg2[%c24, %c0_48, %c0_49] : memref<27x8x128xf32, #tpu.memory_space<vmem>>, vector<1x8x128xf32>
    %72 = vector.shape_cast %71 : vector<1x8x128xf32> to vector<8x128xf32>
    %73 = arith.maximumf %70, %72 : vector<8x128xf32>
    %c25 = arith.constant 25 : index
    %c0_50 = arith.constant 0 : index
    %c0_51 = arith.constant 0 : index
    %74 = vector.load %arg2[%c25, %c0_50, %c0_51] : memref<27x8x128xf32, #tpu.memory_space<vmem>>, vector<1x8x128xf32>
    %75 = vector.shape_cast %74 : vector<1x8x128xf32> to vector<8x128xf32>
    %76 = arith.maximumf %73, %75 : vector<8x128xf32>
    %c26 = arith.constant 26 : index
    %c0_52 = arith.constant 0 : index
    %c0_53 = arith.constant 0 : index
    %77 = vector.load %arg2[%c26, %c0_52, %c0_53] : memref<27x8x128xf32, #tpu.memory_space<vmem>>, vector<1x8x128xf32>
    %78 = vector.shape_cast %77 : vector<1x8x128xf32> to vector<8x128xf32>
    %79 = arith.maximumf %76, %78 : vector<8x128xf32>
    %cst = arith.constant 0.000000e+00 : f32
    %80 = vector.broadcast %cst : f32 to vector<8x128xf32>
    %cst_54 = arith.constant 0.000000e+00 : f32
    %81 = vector.broadcast %cst_54 : f32 to vector<4x8x128xf32>
    %c0_55 = arith.constant 0 : index
    %c0_56 = arith.constant 0 : index
    %c0_57 = arith.constant 0 : index
    %82 = vector.load %arg2[%c0_55, %c0_56, %c0_57] : memref<27x8x128xf32, #tpu.memory_space<vmem>>, vector<1x8x128xf32>
    %83 = vector.shape_cast %82 : vector<1x8x128xf32> to vector<8x128xf32>
    %84 = arith.subf %83, %79 : vector<8x128xf32>
    %85 = math.exp %84 : vector<8x128xf32>
    %86 = arith.addf %80, %85 : vector<8x128xf32>
    %c0_58 = arith.constant 0 : index
    %c0_59 = arith.constant 0 : index
    %c0_60 = arith.constant 0 : index
    %87 = vector.load %arg1[%c0_58, %c0_59, %c0_60] : memref<27x4x128xf32, #tpu.memory_space<vmem>>, vector<1x4x128xf32>
    %88 = vector.shape_cast %87 : vector<1x4x128xf32> to vector<4x128xf32>
    %89 = vector.shape_cast %88 : vector<4x128xf32> to vector<4x1x128xf32>
    %90 = vector.shape_cast %85 : vector<8x128xf32> to vector<1x8x128xf32>
    %91 = vector.broadcast %89 : vector<4x1x128xf32> to vector<4x8x128xf32>
    %92 = vector.broadcast %90 : vector<1x8x128xf32> to vector<4x8x128xf32>
    %93 = arith.mulf %91, %92 : vector<4x8x128xf32>
    %94 = arith.addf %81, %93 : vector<4x8x128xf32>
    %c1_61 = arith.constant 1 : index
    %c0_62 = arith.constant 0 : index
    %c0_63 = arith.constant 0 : index
    %95 = vector.load %arg2[%c1_61, %c0_62, %c0_63] : memref<27x8x128xf32, #tpu.memory_space<vmem>>, vector<1x8x128xf32>
    %96 = vector.shape_cast %95 : vector<1x8x128xf32> to vector<8x128xf32>
    %97 = arith.subf %96, %79 : vector<8x128xf32>
    %98 = math.exp %97 : vector<8x128xf32>
    %99 = arith.addf %86, %98 : vector<8x128xf32>
    %c1_64 = arith.constant 1 : index
    %c0_65 = arith.constant 0 : index
    %c0_66 = arith.constant 0 : index
    %100 = vector.load %arg1[%c1_64, %c0_65, %c0_66] : memref<27x4x128xf32, #tpu.memory_space<vmem>>, vector<1x4x128xf32>
    %101 = vector.shape_cast %100 : vector<1x4x128xf32> to vector<4x128xf32>
    %102 = vector.shape_cast %101 : vector<4x128xf32> to vector<4x1x128xf32>
    %103 = vector.shape_cast %98 : vector<8x128xf32> to vector<1x8x128xf32>
    %104 = vector.broadcast %102 : vector<4x1x128xf32> to vector<4x8x128xf32>
    %105 = vector.broadcast %103 : vector<1x8x128xf32> to vector<4x8x128xf32>
    %106 = arith.mulf %104, %105 : vector<4x8x128xf32>
    %107 = arith.addf %94, %106 : vector<4x8x128xf32>
    %c2_67 = arith.constant 2 : index
    %c0_68 = arith.constant 0 : index
    %c0_69 = arith.constant 0 : index
    %108 = vector.load %arg2[%c2_67, %c0_68, %c0_69] : memref<27x8x128xf32, #tpu.memory_space<vmem>>, vector<1x8x128xf32>
    %109 = vector.shape_cast %108 : vector<1x8x128xf32> to vector<8x128xf32>
    %110 = arith.subf %109, %79 : vector<8x128xf32>
    %111 = math.exp %110 : vector<8x128xf32>
    %112 = arith.addf %99, %111 : vector<8x128xf32>
    %c2_70 = arith.constant 2 : index
    %c0_71 = arith.constant 0 : index
    %c0_72 = arith.constant 0 : index
    %113 = vector.load %arg1[%c2_70, %c0_71, %c0_72] : memref<27x4x128xf32, #tpu.memory_space<vmem>>, vector<1x4x128xf32>
    %114 = vector.shape_cast %113 : vector<1x4x128xf32> to vector<4x128xf32>
    %115 = vector.shape_cast %114 : vector<4x128xf32> to vector<4x1x128xf32>
    %116 = vector.shape_cast %111 : vector<8x128xf32> to vector<1x8x128xf32>
    %117 = vector.broadcast %115 : vector<4x1x128xf32> to vector<4x8x128xf32>
    %118 = vector.broadcast %116 : vector<1x8x128xf32> to vector<4x8x128xf32>
    %119 = arith.mulf %117, %118 : vector<4x8x128xf32>
    %120 = arith.addf %107, %119 : vector<4x8x128xf32>
    %c3_73 = arith.constant 3 : index
    %c0_74 = arith.constant 0 : index
    %c0_75 = arith.constant 0 : index
    %121 = vector.load %arg2[%c3_73, %c0_74, %c0_75] : memref<27x8x128xf32, #tpu.memory_space<vmem>>, vector<1x8x128xf32>
    %122 = vector.shape_cast %121 : vector<1x8x128xf32> to vector<8x128xf32>
    %123 = arith.subf %122, %79 : vector<8x128xf32>
    %124 = math.exp %123 : vector<8x128xf32>
    %125 = arith.addf %112, %124 : vector<8x128xf32>
    %c3_76 = arith.constant 3 : index
    %c0_77 = arith.constant 0 : index
    %c0_78 = arith.constant 0 : index
    %126 = vector.load %arg1[%c3_76, %c0_77, %c0_78] : memref<27x4x128xf32, #tpu.memory_space<vmem>>, vector<1x4x128xf32>
    %127 = vector.shape_cast %126 : vector<1x4x128xf32> to vector<4x128xf32>
    %128 = vector.shape_cast %127 : vector<4x128xf32> to vector<4x1x128xf32>
    %129 = vector.shape_cast %124 : vector<8x128xf32> to vector<1x8x128xf32>
    %130 = vector.broadcast %128 : vector<4x1x128xf32> to vector<4x8x128xf32>
    %131 = vector.broadcast %129 : vector<1x8x128xf32> to vector<4x8x128xf32>
    %132 = arith.mulf %130, %131 : vector<4x8x128xf32>
    %133 = arith.addf %120, %132 : vector<4x8x128xf32>
    %c4_79 = arith.constant 4 : index
    %c0_80 = arith.constant 0 : index
    %c0_81 = arith.constant 0 : index
    %134 = vector.load %arg2[%c4_79, %c0_80, %c0_81] : memref<27x8x128xf32, #tpu.memory_space<vmem>>, vector<1x8x128xf32>
    %135 = vector.shape_cast %134 : vector<1x8x128xf32> to vector<8x128xf32>
    %136 = arith.subf %135, %79 : vector<8x128xf32>
    %137 = math.exp %136 : vector<8x128xf32>
    %138 = arith.addf %125, %137 : vector<8x128xf32>
    %c4_82 = arith.constant 4 : index
    %c0_83 = arith.constant 0 : index
    %c0_84 = arith.constant 0 : index
    %139 = vector.load %arg1[%c4_82, %c0_83, %c0_84] : memref<27x4x128xf32, #tpu.memory_space<vmem>>, vector<1x4x128xf32>
    %140 = vector.shape_cast %139 : vector<1x4x128xf32> to vector<4x128xf32>
    %141 = vector.shape_cast %140 : vector<4x128xf32> to vector<4x1x128xf32>
    %142 = vector.shape_cast %137 : vector<8x128xf32> to vector<1x8x128xf32>
    %143 = vector.broadcast %141 : vector<4x1x128xf32> to vector<4x8x128xf32>
    %144 = vector.broadcast %142 : vector<1x8x128xf32> to vector<4x8x128xf32>
    %145 = arith.mulf %143, %144 : vector<4x8x128xf32>
    %146 = arith.addf %133, %145 : vector<4x8x128xf32>
    %c5_85 = arith.constant 5 : index
    %c0_86 = arith.constant 0 : index
    %c0_87 = arith.constant 0 : index
    %147 = vector.load %arg2[%c5_85, %c0_86, %c0_87] : memref<27x8x128xf32, #tpu.memory_space<vmem>>, vector<1x8x128xf32>
    %148 = vector.shape_cast %147 : vector<1x8x128xf32> to vector<8x128xf32>
    %149 = arith.subf %148, %79 : vector<8x128xf32>
    %150 = math.exp %149 : vector<8x128xf32>
    %151 = arith.addf %138, %150 : vector<8x128xf32>
    %c5_88 = arith.constant 5 : index
    %c0_89 = arith.constant 0 : index
    %c0_90 = arith.constant 0 : index
    %152 = vector.load %arg1[%c5_88, %c0_89, %c0_90] : memref<27x4x128xf32, #tpu.memory_space<vmem>>, vector<1x4x128xf32>
    %153 = vector.shape_cast %152 : vector<1x4x128xf32> to vector<4x128xf32>
    %154 = vector.shape_cast %153 : vector<4x128xf32> to vector<4x1x128xf32>
    %155 = vector.shape_cast %150 : vector<8x128xf32> to vector<1x8x128xf32>
    %156 = vector.broadcast %154 : vector<4x1x128xf32> to vector<4x8x128xf32>
    %157 = vector.broadcast %155 : vector<1x8x128xf32> to vector<4x8x128xf32>
    %158 = arith.mulf %156, %157 : vector<4x8x128xf32>
    %159 = arith.addf %146, %158 : vector<4x8x128xf32>
    %c6_91 = arith.constant 6 : index
    %c0_92 = arith.constant 0 : index
    %c0_93 = arith.constant 0 : index
    %160 = vector.load %arg2[%c6_91, %c0_92, %c0_93] : memref<27x8x128xf32, #tpu.memory_space<vmem>>, vector<1x8x128xf32>
    %161 = vector.shape_cast %160 : vector<1x8x128xf32> to vector<8x128xf32>
    %162 = arith.subf %161, %79 : vector<8x128xf32>
    %163 = math.exp %162 : vector<8x128xf32>
    %164 = arith.addf %151, %163 : vector<8x128xf32>
    %c6_94 = arith.constant 6 : index
    %c0_95 = arith.constant 0 : index
    %c0_96 = arith.constant 0 : index
    %165 = vector.load %arg1[%c6_94, %c0_95, %c0_96] : memref<27x4x128xf32, #tpu.memory_space<vmem>>, vector<1x4x128xf32>
    %166 = vector.shape_cast %165 : vector<1x4x128xf32> to vector<4x128xf32>
    %167 = vector.shape_cast %166 : vector<4x128xf32> to vector<4x1x128xf32>
    %168 = vector.shape_cast %163 : vector<8x128xf32> to vector<1x8x128xf32>
    %169 = vector.broadcast %167 : vector<4x1x128xf32> to vector<4x8x128xf32>
    %170 = vector.broadcast %168 : vector<1x8x128xf32> to vector<4x8x128xf32>
    %171 = arith.mulf %169, %170 : vector<4x8x128xf32>
    %172 = arith.addf %159, %171 : vector<4x8x128xf32>
    %c7_97 = arith.constant 7 : index
    %c0_98 = arith.constant 0 : index
    %c0_99 = arith.constant 0 : index
    %173 = vector.load %arg2[%c7_97, %c0_98, %c0_99] : memref<27x8x128xf32, #tpu.memory_space<vmem>>, vector<1x8x128xf32>
    %174 = vector.shape_cast %173 : vector<1x8x128xf32> to vector<8x128xf32>
    %175 = arith.subf %174, %79 : vector<8x128xf32>
    %176 = math.exp %175 : vector<8x128xf32>
    %177 = arith.addf %164, %176 : vector<8x128xf32>
    %c7_100 = arith.constant 7 : index
    %c0_101 = arith.constant 0 : index
    %c0_102 = arith.constant 0 : index
    %178 = vector.load %arg1[%c7_100, %c0_101, %c0_102] : memref<27x4x128xf32, #tpu.memory_space<vmem>>, vector<1x4x128xf32>
    %179 = vector.shape_cast %178 : vector<1x4x128xf32> to vector<4x128xf32>
    %180 = vector.shape_cast %179 : vector<4x128xf32> to vector<4x1x128xf32>
    %181 = vector.shape_cast %176 : vector<8x128xf32> to vector<1x8x128xf32>
    %182 = vector.broadcast %180 : vector<4x1x128xf32> to vector<4x8x128xf32>
    %183 = vector.broadcast %181 : vector<1x8x128xf32> to vector<4x8x128xf32>
    %184 = arith.mulf %182, %183 : vector<4x8x128xf32>
    %185 = arith.addf %172, %184 : vector<4x8x128xf32>
    %c8_103 = arith.constant 8 : index
    %c0_104 = arith.constant 0 : index
    %c0_105 = arith.constant 0 : index
    %186 = vector.load %arg2[%c8_103, %c0_104, %c0_105] : memref<27x8x128xf32, #tpu.memory_space<vmem>>, vector<1x8x128xf32>
    %187 = vector.shape_cast %186 : vector<1x8x128xf32> to vector<8x128xf32>
    %188 = arith.subf %187, %79 : vector<8x128xf32>
    %189 = math.exp %188 : vector<8x128xf32>
    %190 = arith.addf %177, %189 : vector<8x128xf32>
    %c8_106 = arith.constant 8 : index
    %c0_107 = arith.constant 0 : index
    %c0_108 = arith.constant 0 : index
    %191 = vector.load %arg1[%c8_106, %c0_107, %c0_108] : memref<27x4x128xf32, #tpu.memory_space<vmem>>, vector<1x4x128xf32>
    %192 = vector.shape_cast %191 : vector<1x4x128xf32> to vector<4x128xf32>
    %193 = vector.shape_cast %192 : vector<4x128xf32> to vector<4x1x128xf32>
    %194 = vector.shape_cast %189 : vector<8x128xf32> to vector<1x8x128xf32>
    %195 = vector.broadcast %193 : vector<4x1x128xf32> to vector<4x8x128xf32>
    %196 = vector.broadcast %194 : vector<1x8x128xf32> to vector<4x8x128xf32>
    %197 = arith.mulf %195, %196 : vector<4x8x128xf32>
    %198 = arith.addf %185, %197 : vector<4x8x128xf32>
    %c9_109 = arith.constant 9 : index
    %c0_110 = arith.constant 0 : index
    %c0_111 = arith.constant 0 : index
    %199 = vector.load %arg2[%c9_109, %c0_110, %c0_111] : memref<27x8x128xf32, #tpu.memory_space<vmem>>, vector<1x8x128xf32>
    %200 = vector.shape_cast %199 : vector<1x8x128xf32> to vector<8x128xf32>
    %201 = arith.subf %200, %79 : vector<8x128xf32>
    %202 = math.exp %201 : vector<8x128xf32>
    %203 = arith.addf %190, %202 : vector<8x128xf32>
    %c9_112 = arith.constant 9 : index
    %c0_113 = arith.constant 0 : index
    %c0_114 = arith.constant 0 : index
    %204 = vector.load %arg1[%c9_112, %c0_113, %c0_114] : memref<27x4x128xf32, #tpu.memory_space<vmem>>, vector<1x4x128xf32>
    %205 = vector.shape_cast %204 : vector<1x4x128xf32> to vector<4x128xf32>
    %206 = vector.shape_cast %205 : vector<4x128xf32> to vector<4x1x128xf32>
    %207 = vector.shape_cast %202 : vector<8x128xf32> to vector<1x8x128xf32>
    %208 = vector.broadcast %206 : vector<4x1x128xf32> to vector<4x8x128xf32>
    %209 = vector.broadcast %207 : vector<1x8x128xf32> to vector<4x8x128xf32>
    %210 = arith.mulf %208, %209 : vector<4x8x128xf32>
    %211 = arith.addf %198, %210 : vector<4x8x128xf32>
    %c10_115 = arith.constant 10 : index
    %c0_116 = arith.constant 0 : index
    %c0_117 = arith.constant 0 : index
    %212 = vector.load %arg2[%c10_115, %c0_116, %c0_117] : memref<27x8x128xf32, #tpu.memory_space<vmem>>, vector<1x8x128xf32>
    %213 = vector.shape_cast %212 : vector<1x8x128xf32> to vector<8x128xf32>
    %214 = arith.subf %213, %79 : vector<8x128xf32>
    %215 = math.exp %214 : vector<8x128xf32>
    %216 = arith.addf %203, %215 : vector<8x128xf32>
    %c10_118 = arith.constant 10 : index
    %c0_119 = arith.constant 0 : index
    %c0_120 = arith.constant 0 : index
    %217 = vector.load %arg1[%c10_118, %c0_119, %c0_120] : memref<27x4x128xf32, #tpu.memory_space<vmem>>, vector<1x4x128xf32>
    %218 = vector.shape_cast %217 : vector<1x4x128xf32> to vector<4x128xf32>
    %219 = vector.shape_cast %218 : vector<4x128xf32> to vector<4x1x128xf32>
    %220 = vector.shape_cast %215 : vector<8x128xf32> to vector<1x8x128xf32>
    %221 = vector.broadcast %219 : vector<4x1x128xf32> to vector<4x8x128xf32>
    %222 = vector.broadcast %220 : vector<1x8x128xf32> to vector<4x8x128xf32>
    %223 = arith.mulf %221, %222 : vector<4x8x128xf32>
    %224 = arith.addf %211, %223 : vector<4x8x128xf32>
    %c11_121 = arith.constant 11 : index
    %c0_122 = arith.constant 0 : index
    %c0_123 = arith.constant 0 : index
    %225 = vector.load %arg2[%c11_121, %c0_122, %c0_123] : memref<27x8x128xf32, #tpu.memory_space<vmem>>, vector<1x8x128xf32>
    %226 = vector.shape_cast %225 : vector<1x8x128xf32> to vector<8x128xf32>
    %227 = arith.subf %226, %79 : vector<8x128xf32>
    %228 = math.exp %227 : vector<8x128xf32>
    %229 = arith.addf %216, %228 : vector<8x128xf32>
    %c11_124 = arith.constant 11 : index
    %c0_125 = arith.constant 0 : index
    %c0_126 = arith.constant 0 : index
    %230 = vector.load %arg1[%c11_124, %c0_125, %c0_126] : memref<27x4x128xf32, #tpu.memory_space<vmem>>, vector<1x4x128xf32>
    %231 = vector.shape_cast %230 : vector<1x4x128xf32> to vector<4x128xf32>
    %232 = vector.shape_cast %231 : vector<4x128xf32> to vector<4x1x128xf32>
    %233 = vector.shape_cast %228 : vector<8x128xf32> to vector<1x8x128xf32>
    %234 = vector.broadcast %232 : vector<4x1x128xf32> to vector<4x8x128xf32>
    %235 = vector.broadcast %233 : vector<1x8x128xf32> to vector<4x8x128xf32>
    %236 = arith.mulf %234, %235 : vector<4x8x128xf32>
    %237 = arith.addf %224, %236 : vector<4x8x128xf32>
    %c12_127 = arith.constant 12 : index
    %c0_128 = arith.constant 0 : index
    %c0_129 = arith.constant 0 : index
    %238 = vector.load %arg2[%c12_127, %c0_128, %c0_129] : memref<27x8x128xf32, #tpu.memory_space<vmem>>, vector<1x8x128xf32>
    %239 = vector.shape_cast %238 : vector<1x8x128xf32> to vector<8x128xf32>
    %240 = arith.subf %239, %79 : vector<8x128xf32>
    %241 = math.exp %240 : vector<8x128xf32>
    %242 = arith.addf %229, %241 : vector<8x128xf32>
    %c12_130 = arith.constant 12 : index
    %c0_131 = arith.constant 0 : index
    %c0_132 = arith.constant 0 : index
    %243 = vector.load %arg1[%c12_130, %c0_131, %c0_132] : memref<27x4x128xf32, #tpu.memory_space<vmem>>, vector<1x4x128xf32>
    %244 = vector.shape_cast %243 : vector<1x4x128xf32> to vector<4x128xf32>
    %245 = vector.shape_cast %244 : vector<4x128xf32> to vector<4x1x128xf32>
    %246 = vector.shape_cast %241 : vector<8x128xf32> to vector<1x8x128xf32>
    %247 = vector.broadcast %245 : vector<4x1x128xf32> to vector<4x8x128xf32>
    %248 = vector.broadcast %246 : vector<1x8x128xf32> to vector<4x8x128xf32>
    %249 = arith.mulf %247, %248 : vector<4x8x128xf32>
    %250 = arith.addf %237, %249 : vector<4x8x128xf32>
    %c13_133 = arith.constant 13 : index
    %c0_134 = arith.constant 0 : index
    %c0_135 = arith.constant 0 : index
    %251 = vector.load %arg2[%c13_133, %c0_134, %c0_135] : memref<27x8x128xf32, #tpu.memory_space<vmem>>, vector<1x8x128xf32>
    %252 = vector.shape_cast %251 : vector<1x8x128xf32> to vector<8x128xf32>
    %253 = arith.subf %252, %79 : vector<8x128xf32>
    %254 = math.exp %253 : vector<8x128xf32>
    %255 = arith.addf %242, %254 : vector<8x128xf32>
    %c13_136 = arith.constant 13 : index
    %c0_137 = arith.constant 0 : index
    %c0_138 = arith.constant 0 : index
    %256 = vector.load %arg1[%c13_136, %c0_137, %c0_138] : memref<27x4x128xf32, #tpu.memory_space<vmem>>, vector<1x4x128xf32>
    %257 = vector.shape_cast %256 : vector<1x4x128xf32> to vector<4x128xf32>
    %258 = vector.shape_cast %257 : vector<4x128xf32> to vector<4x1x128xf32>
    %259 = vector.shape_cast %254 : vector<8x128xf32> to vector<1x8x128xf32>
    %260 = vector.broadcast %258 : vector<4x1x128xf32> to vector<4x8x128xf32>
    %261 = vector.broadcast %259 : vector<1x8x128xf32> to vector<4x8x128xf32>
    %262 = arith.mulf %260, %261 : vector<4x8x128xf32>
    %263 = arith.addf %250, %262 : vector<4x8x128xf32>
    %c14_139 = arith.constant 14 : index
    %c0_140 = arith.constant 0 : index
    %c0_141 = arith.constant 0 : index
    %264 = vector.load %arg2[%c14_139, %c0_140, %c0_141] : memref<27x8x128xf32, #tpu.memory_space<vmem>>, vector<1x8x128xf32>
    %265 = vector.shape_cast %264 : vector<1x8x128xf32> to vector<8x128xf32>
    %266 = arith.subf %265, %79 : vector<8x128xf32>
    %267 = math.exp %266 : vector<8x128xf32>
    %268 = arith.addf %255, %267 : vector<8x128xf32>
    %c14_142 = arith.constant 14 : index
    %c0_143 = arith.constant 0 : index
    %c0_144 = arith.constant 0 : index
    %269 = vector.load %arg1[%c14_142, %c0_143, %c0_144] : memref<27x4x128xf32, #tpu.memory_space<vmem>>, vector<1x4x128xf32>
    %270 = vector.shape_cast %269 : vector<1x4x128xf32> to vector<4x128xf32>
    %271 = vector.shape_cast %270 : vector<4x128xf32> to vector<4x1x128xf32>
    %272 = vector.shape_cast %267 : vector<8x128xf32> to vector<1x8x128xf32>
    %273 = vector.broadcast %271 : vector<4x1x128xf32> to vector<4x8x128xf32>
    %274 = vector.broadcast %272 : vector<1x8x128xf32> to vector<4x8x128xf32>
    %275 = arith.mulf %273, %274 : vector<4x8x128xf32>
    %276 = arith.addf %263, %275 : vector<4x8x128xf32>
    %c15_145 = arith.constant 15 : index
    %c0_146 = arith.constant 0 : index
    %c0_147 = arith.constant 0 : index
    %277 = vector.load %arg2[%c15_145, %c0_146, %c0_147] : memref<27x8x128xf32, #tpu.memory_space<vmem>>, vector<1x8x128xf32>
    %278 = vector.shape_cast %277 : vector<1x8x128xf32> to vector<8x128xf32>
    %279 = arith.subf %278, %79 : vector<8x128xf32>
    %280 = math.exp %279 : vector<8x128xf32>
    %281 = arith.addf %268, %280 : vector<8x128xf32>
    %c15_148 = arith.constant 15 : index
    %c0_149 = arith.constant 0 : index
    %c0_150 = arith.constant 0 : index
    %282 = vector.load %arg1[%c15_148, %c0_149, %c0_150] : memref<27x4x128xf32, #tpu.memory_space<vmem>>, vector<1x4x128xf32>
    %283 = vector.shape_cast %282 : vector<1x4x128xf32> to vector<4x128xf32>
    %284 = vector.shape_cast %283 : vector<4x128xf32> to vector<4x1x128xf32>
    %285 = vector.shape_cast %280 : vector<8x128xf32> to vector<1x8x128xf32>
    %286 = vector.broadcast %284 : vector<4x1x128xf32> to vector<4x8x128xf32>
    %287 = vector.broadcast %285 : vector<1x8x128xf32> to vector<4x8x128xf32>
    %288 = arith.mulf %286, %287 : vector<4x8x128xf32>
    %289 = arith.addf %276, %288 : vector<4x8x128xf32>
    %c16_151 = arith.constant 16 : index
    %c0_152 = arith.constant 0 : index
    %c0_153 = arith.constant 0 : index
    %290 = vector.load %arg2[%c16_151, %c0_152, %c0_153] : memref<27x8x128xf32, #tpu.memory_space<vmem>>, vector<1x8x128xf32>
    %291 = vector.shape_cast %290 : vector<1x8x128xf32> to vector<8x128xf32>
    %292 = arith.subf %291, %79 : vector<8x128xf32>
    %293 = math.exp %292 : vector<8x128xf32>
    %294 = arith.addf %281, %293 : vector<8x128xf32>
    %c16_154 = arith.constant 16 : index
    %c0_155 = arith.constant 0 : index
    %c0_156 = arith.constant 0 : index
    %295 = vector.load %arg1[%c16_154, %c0_155, %c0_156] : memref<27x4x128xf32, #tpu.memory_space<vmem>>, vector<1x4x128xf32>
    %296 = vector.shape_cast %295 : vector<1x4x128xf32> to vector<4x128xf32>
    %297 = vector.shape_cast %296 : vector<4x128xf32> to vector<4x1x128xf32>
    %298 = vector.shape_cast %293 : vector<8x128xf32> to vector<1x8x128xf32>
    %299 = vector.broadcast %297 : vector<4x1x128xf32> to vector<4x8x128xf32>
    %300 = vector.broadcast %298 : vector<1x8x128xf32> to vector<4x8x128xf32>
    %301 = arith.mulf %299, %300 : vector<4x8x128xf32>
    %302 = arith.addf %289, %301 : vector<4x8x128xf32>
    %c17_157 = arith.constant 17 : index
    %c0_158 = arith.constant 0 : index
    %c0_159 = arith.constant 0 : index
    %303 = vector.load %arg2[%c17_157, %c0_158, %c0_159] : memref<27x8x128xf32, #tpu.memory_space<vmem>>, vector<1x8x128xf32>
    %304 = vector.shape_cast %303 : vector<1x8x128xf32> to vector<8x128xf32>
    %305 = arith.subf %304, %79 : vector<8x128xf32>
    %306 = math.exp %305 : vector<8x128xf32>
    %307 = arith.addf %294, %306 : vector<8x128xf32>
    %c17_160 = arith.constant 17 : index
    %c0_161 = arith.constant 0 : index
    %c0_162 = arith.constant 0 : index
    %308 = vector.load %arg1[%c17_160, %c0_161, %c0_162] : memref<27x4x128xf32, #tpu.memory_space<vmem>>, vector<1x4x128xf32>
    %309 = vector.shape_cast %308 : vector<1x4x128xf32> to vector<4x128xf32>
    %310 = vector.shape_cast %309 : vector<4x128xf32> to vector<4x1x128xf32>
    %311 = vector.shape_cast %306 : vector<8x128xf32> to vector<1x8x128xf32>
    %312 = vector.broadcast %310 : vector<4x1x128xf32> to vector<4x8x128xf32>
    %313 = vector.broadcast %311 : vector<1x8x128xf32> to vector<4x8x128xf32>
    %314 = arith.mulf %312, %313 : vector<4x8x128xf32>
    %315 = arith.addf %302, %314 : vector<4x8x128xf32>
    %c18_163 = arith.constant 18 : index
    %c0_164 = arith.constant 0 : index
    %c0_165 = arith.constant 0 : index
    %316 = vector.load %arg2[%c18_163, %c0_164, %c0_165] : memref<27x8x128xf32, #tpu.memory_space<vmem>>, vector<1x8x128xf32>
    %317 = vector.shape_cast %316 : vector<1x8x128xf32> to vector<8x128xf32>
    %318 = arith.subf %317, %79 : vector<8x128xf32>
    %319 = math.exp %318 : vector<8x128xf32>
    %320 = arith.addf %307, %319 : vector<8x128xf32>
    %c18_166 = arith.constant 18 : index
    %c0_167 = arith.constant 0 : index
    %c0_168 = arith.constant 0 : index
    %321 = vector.load %arg1[%c18_166, %c0_167, %c0_168] : memref<27x4x128xf32, #tpu.memory_space<vmem>>, vector<1x4x128xf32>
    %322 = vector.shape_cast %321 : vector<1x4x128xf32> to vector<4x128xf32>
    %323 = vector.shape_cast %322 : vector<4x128xf32> to vector<4x1x128xf32>
    %324 = vector.shape_cast %319 : vector<8x128xf32> to vector<1x8x128xf32>
    %325 = vector.broadcast %323 : vector<4x1x128xf32> to vector<4x8x128xf32>
    %326 = vector.broadcast %324 : vector<1x8x128xf32> to vector<4x8x128xf32>
    %327 = arith.mulf %325, %326 : vector<4x8x128xf32>
    %328 = arith.addf %315, %327 : vector<4x8x128xf32>
    %c19_169 = arith.constant 19 : index
    %c0_170 = arith.constant 0 : index
    %c0_171 = arith.constant 0 : index
    %329 = vector.load %arg2[%c19_169, %c0_170, %c0_171] : memref<27x8x128xf32, #tpu.memory_space<vmem>>, vector<1x8x128xf32>
    %330 = vector.shape_cast %329 : vector<1x8x128xf32> to vector<8x128xf32>
    %331 = arith.subf %330, %79 : vector<8x128xf32>
    %332 = math.exp %331 : vector<8x128xf32>
    %333 = arith.addf %320, %332 : vector<8x128xf32>
    %c19_172 = arith.constant 19 : index
    %c0_173 = arith.constant 0 : index
    %c0_174 = arith.constant 0 : index
    %334 = vector.load %arg1[%c19_172, %c0_173, %c0_174] : memref<27x4x128xf32, #tpu.memory_space<vmem>>, vector<1x4x128xf32>
    %335 = vector.shape_cast %334 : vector<1x4x128xf32> to vector<4x128xf32>
    %336 = vector.shape_cast %335 : vector<4x128xf32> to vector<4x1x128xf32>
    %337 = vector.shape_cast %332 : vector<8x128xf32> to vector<1x8x128xf32>
    %338 = vector.broadcast %336 : vector<4x1x128xf32> to vector<4x8x128xf32>
    %339 = vector.broadcast %337 : vector<1x8x128xf32> to vector<4x8x128xf32>
    %340 = arith.mulf %338, %339 : vector<4x8x128xf32>
    %341 = arith.addf %328, %340 : vector<4x8x128xf32>
    %c20_175 = arith.constant 20 : index
    %c0_176 = arith.constant 0 : index
    %c0_177 = arith.constant 0 : index
    %342 = vector.load %arg2[%c20_175, %c0_176, %c0_177] : memref<27x8x128xf32, #tpu.memory_space<vmem>>, vector<1x8x128xf32>
    %343 = vector.shape_cast %342 : vector<1x8x128xf32> to vector<8x128xf32>
    %344 = arith.subf %343, %79 : vector<8x128xf32>
    %345 = math.exp %344 : vector<8x128xf32>
    %346 = arith.addf %333, %345 : vector<8x128xf32>
    %c20_178 = arith.constant 20 : index
    %c0_179 = arith.constant 0 : index
    %c0_180 = arith.constant 0 : index
    %347 = vector.load %arg1[%c20_178, %c0_179, %c0_180] : memref<27x4x128xf32, #tpu.memory_space<vmem>>, vector<1x4x128xf32>
    %348 = vector.shape_cast %347 : vector<1x4x128xf32> to vector<4x128xf32>
    %349 = vector.shape_cast %348 : vector<4x128xf32> to vector<4x1x128xf32>
    %350 = vector.shape_cast %345 : vector<8x128xf32> to vector<1x8x128xf32>
    %351 = vector.broadcast %349 : vector<4x1x128xf32> to vector<4x8x128xf32>
    %352 = vector.broadcast %350 : vector<1x8x128xf32> to vector<4x8x128xf32>
    %353 = arith.mulf %351, %352 : vector<4x8x128xf32>
    %354 = arith.addf %341, %353 : vector<4x8x128xf32>
    %c21_181 = arith.constant 21 : index
    %c0_182 = arith.constant 0 : index
    %c0_183 = arith.constant 0 : index
    %355 = vector.load %arg2[%c21_181, %c0_182, %c0_183] : memref<27x8x128xf32, #tpu.memory_space<vmem>>, vector<1x8x128xf32>
    %356 = vector.shape_cast %355 : vector<1x8x128xf32> to vector<8x128xf32>
    %357 = arith.subf %356, %79 : vector<8x128xf32>
    %358 = math.exp %357 : vector<8x128xf32>
    %359 = arith.addf %346, %358 : vector<8x128xf32>
    %c21_184 = arith.constant 21 : index
    %c0_185 = arith.constant 0 : index
    %c0_186 = arith.constant 0 : index
    %360 = vector.load %arg1[%c21_184, %c0_185, %c0_186] : memref<27x4x128xf32, #tpu.memory_space<vmem>>, vector<1x4x128xf32>
    %361 = vector.shape_cast %360 : vector<1x4x128xf32> to vector<4x128xf32>
    %362 = vector.shape_cast %361 : vector<4x128xf32> to vector<4x1x128xf32>
    %363 = vector.shape_cast %358 : vector<8x128xf32> to vector<1x8x128xf32>
    %364 = vector.broadcast %362 : vector<4x1x128xf32> to vector<4x8x128xf32>
    %365 = vector.broadcast %363 : vector<1x8x128xf32> to vector<4x8x128xf32>
    %366 = arith.mulf %364, %365 : vector<4x8x128xf32>
    %367 = arith.addf %354, %366 : vector<4x8x128xf32>
    %c22_187 = arith.constant 22 : index
    %c0_188 = arith.constant 0 : index
    %c0_189 = arith.constant 0 : index
    %368 = vector.load %arg2[%c22_187, %c0_188, %c0_189] : memref<27x8x128xf32, #tpu.memory_space<vmem>>, vector<1x8x128xf32>
    %369 = vector.shape_cast %368 : vector<1x8x128xf32> to vector<8x128xf32>
    %370 = arith.subf %369, %79 : vector<8x128xf32>
    %371 = math.exp %370 : vector<8x128xf32>
    %372 = arith.addf %359, %371 : vector<8x128xf32>
    %c22_190 = arith.constant 22 : index
    %c0_191 = arith.constant 0 : index
    %c0_192 = arith.constant 0 : index
    %373 = vector.load %arg1[%c22_190, %c0_191, %c0_192] : memref<27x4x128xf32, #tpu.memory_space<vmem>>, vector<1x4x128xf32>
    %374 = vector.shape_cast %373 : vector<1x4x128xf32> to vector<4x128xf32>
    %375 = vector.shape_cast %374 : vector<4x128xf32> to vector<4x1x128xf32>
    %376 = vector.shape_cast %371 : vector<8x128xf32> to vector<1x8x128xf32>
    %377 = vector.broadcast %375 : vector<4x1x128xf32> to vector<4x8x128xf32>
    %378 = vector.broadcast %376 : vector<1x8x128xf32> to vector<4x8x128xf32>
    %379 = arith.mulf %377, %378 : vector<4x8x128xf32>
    %380 = arith.addf %367, %379 : vector<4x8x128xf32>
    %c23_193 = arith.constant 23 : index
    %c0_194 = arith.constant 0 : index
    %c0_195 = arith.constant 0 : index
    %381 = vector.load %arg2[%c23_193, %c0_194, %c0_195] : memref<27x8x128xf32, #tpu.memory_space<vmem>>, vector<1x8x128xf32>
    %382 = vector.shape_cast %381 : vector<1x8x128xf32> to vector<8x128xf32>
    %383 = arith.subf %382, %79 : vector<8x128xf32>
    %384 = math.exp %383 : vector<8x128xf32>
    %385 = arith.addf %372, %384 : vector<8x128xf32>
    %c23_196 = arith.constant 23 : index
    %c0_197 = arith.constant 0 : index
    %c0_198 = arith.constant 0 : index
    %386 = vector.load %arg1[%c23_196, %c0_197, %c0_198] : memref<27x4x128xf32, #tpu.memory_space<vmem>>, vector<1x4x128xf32>
    %387 = vector.shape_cast %386 : vector<1x4x128xf32> to vector<4x128xf32>
    %388 = vector.shape_cast %387 : vector<4x128xf32> to vector<4x1x128xf32>
    %389 = vector.shape_cast %384 : vector<8x128xf32> to vector<1x8x128xf32>
    %390 = vector.broadcast %388 : vector<4x1x128xf32> to vector<4x8x128xf32>
    %391 = vector.broadcast %389 : vector<1x8x128xf32> to vector<4x8x128xf32>
    %392 = arith.mulf %390, %391 : vector<4x8x128xf32>
    %393 = arith.addf %380, %392 : vector<4x8x128xf32>
    %c24_199 = arith.constant 24 : index
    %c0_200 = arith.constant 0 : index
    %c0_201 = arith.constant 0 : index
    %394 = vector.load %arg2[%c24_199, %c0_200, %c0_201] : memref<27x8x128xf32, #tpu.memory_space<vmem>>, vector<1x8x128xf32>
    %395 = vector.shape_cast %394 : vector<1x8x128xf32> to vector<8x128xf32>
    %396 = arith.subf %395, %79 : vector<8x128xf32>
    %397 = math.exp %396 : vector<8x128xf32>
    %398 = arith.addf %385, %397 : vector<8x128xf32>
    %c24_202 = arith.constant 24 : index
    %c0_203 = arith.constant 0 : index
    %c0_204 = arith.constant 0 : index
    %399 = vector.load %arg1[%c24_202, %c0_203, %c0_204] : memref<27x4x128xf32, #tpu.memory_space<vmem>>, vector<1x4x128xf32>
    %400 = vector.shape_cast %399 : vector<1x4x128xf32> to vector<4x128xf32>
    %401 = vector.shape_cast %400 : vector<4x128xf32> to vector<4x1x128xf32>
    %402 = vector.shape_cast %397 : vector<8x128xf32> to vector<1x8x128xf32>
    %403 = vector.broadcast %401 : vector<4x1x128xf32> to vector<4x8x128xf32>
    %404 = vector.broadcast %402 : vector<1x8x128xf32> to vector<4x8x128xf32>
    %405 = arith.mulf %403, %404 : vector<4x8x128xf32>
    %406 = arith.addf %393, %405 : vector<4x8x128xf32>
    %c25_205 = arith.constant 25 : index
    %c0_206 = arith.constant 0 : index
    %c0_207 = arith.constant 0 : index
    %407 = vector.load %arg2[%c25_205, %c0_206, %c0_207] : memref<27x8x128xf32, #tpu.memory_space<vmem>>, vector<1x8x128xf32>
    %408 = vector.shape_cast %407 : vector<1x8x128xf32> to vector<8x128xf32>
    %409 = arith.subf %408, %79 : vector<8x128xf32>
    %410 = math.exp %409 : vector<8x128xf32>
    %411 = arith.addf %398, %410 : vector<8x128xf32>
    %c25_208 = arith.constant 25 : index
    %c0_209 = arith.constant 0 : index
    %c0_210 = arith.constant 0 : index
    %412 = vector.load %arg1[%c25_208, %c0_209, %c0_210] : memref<27x4x128xf32, #tpu.memory_space<vmem>>, vector<1x4x128xf32>
    %413 = vector.shape_cast %412 : vector<1x4x128xf32> to vector<4x128xf32>
    %414 = vector.shape_cast %413 : vector<4x128xf32> to vector<4x1x128xf32>
    %415 = vector.shape_cast %410 : vector<8x128xf32> to vector<1x8x128xf32>
    %416 = vector.broadcast %414 : vector<4x1x128xf32> to vector<4x8x128xf32>
    %417 = vector.broadcast %415 : vector<1x8x128xf32> to vector<4x8x128xf32>
    %418 = arith.mulf %416, %417 : vector<4x8x128xf32>
    %419 = arith.addf %406, %418 : vector<4x8x128xf32>
    %c26_211 = arith.constant 26 : index
    %c0_212 = arith.constant 0 : index
    %c0_213 = arith.constant 0 : index
    %420 = vector.load %arg2[%c26_211, %c0_212, %c0_213] : memref<27x8x128xf32, #tpu.memory_space<vmem>>, vector<1x8x128xf32>
    %421 = vector.shape_cast %420 : vector<1x8x128xf32> to vector<8x128xf32>
    %422 = arith.subf %421, %79 : vector<8x128xf32>
    %423 = math.exp %422 : vector<8x128xf32>
    %424 = arith.addf %411, %423 : vector<8x128xf32>
    %c26_214 = arith.constant 26 : index
    %c0_215 = arith.constant 0 : index
    %c0_216 = arith.constant 0 : index
    %425 = vector.load %arg1[%c26_214, %c0_215, %c0_216] : memref<27x4x128xf32, #tpu.memory_space<vmem>>, vector<1x4x128xf32>
    %426 = vector.shape_cast %425 : vector<1x4x128xf32> to vector<4x128xf32>
    %427 = vector.shape_cast %426 : vector<4x128xf32> to vector<4x1x128xf32>
    %428 = vector.shape_cast %423 : vector<8x128xf32> to vector<1x8x128xf32>
    %429 = vector.broadcast %427 : vector<4x1x128xf32> to vector<4x8x128xf32>
    %430 = vector.broadcast %428 : vector<1x8x128xf32> to vector<4x8x128xf32>
    %431 = arith.mulf %429, %430 : vector<4x8x128xf32>
    %432 = arith.addf %419, %431 : vector<4x8x128xf32>
    %433 = tpu.reciprocal %424 {approx = true} : vector<8x128xf32> -> vector<8x128xf32>
    %434 = vector.shape_cast %433 : vector<8x128xf32> to vector<1x8x128xf32>
    %435 = vector.broadcast %434 : vector<1x8x128xf32> to vector<4x8x128xf32>
    %436 = arith.mulf %432, %435 : vector<4x8x128xf32>
    %c0_217 = arith.constant 0 : index
    %c0_218 = arith.constant 0 : index
    %c0_219 = arith.constant 0 : index
    %437 = vector.load %arg3[%c0_217, %c0_218, %c0_219] : memref<4x1x1xf32, #tpu.memory_space<vmem>>, vector<4x1x1xf32>
    %438 = vector.broadcast %437 : vector<4x1x1xf32> to vector<4x8x128xf32>
    %439 = arith.addf %436, %438 : vector<4x8x128xf32>
    %c0_220 = arith.constant 0 : index
    %c0_221 = arith.constant 0 : index
    %c0_222 = arith.constant 0 : index
    %440 = vector.load %arg4[%c0_220, %c0_221, %c0_222] : memref<4x8x128xf32, #tpu.memory_space<vmem>>, vector<4x8x128xf32>
    tpu.vector_store %arg4[%c0_220, %c0_221, %c0_222], %439 {strides = array<i32>} : memref<4x8x128xf32, #tpu.memory_space<vmem>>, vector<4x8x128xf32>,
    return
  }
  func.func @transform_0(%arg0: i32) -> (i32, i32, i32) {
    %c0_i32 = arith.constant 0 : i32
    %c0_i32_0 = arith.constant 0 : i32
    %c0_i32_1 = arith.constant 0 : i32
    return %c0_i32, %c0_i32_0, %arg0 : i32, i32, i32
  }
  func.func @transform_1(%arg0: i32) -> (i32, i32, i32) {
    %c0_i32 = arith.constant 0 : i32
    %c0_i32_0 = arith.constant 0 : i32
    %c0_i32_1 = arith.constant 0 : i32
    return %c0_i32, %c0_i32_0, %arg0 : i32, i32, i32
  }
  func.func @transform_2(%arg0: i32) -> (i32, i32, i32) {
    %c0_i32 = arith.constant 0 : i32
    %c0_i32_0 = arith.constant 0 : i32
    %c0_i32_1 = arith.constant 0 : i32
    %c0_i32_2 = arith.constant 0 : i32
    return %c0_i32, %c0_i32_0, %c0_i32_1 : i32, i32, i32
  }
  func.func @transform_3(%arg0: i32) -> (i32, i32, i32) {
    %c0_i32 = arith.constant 0 : i32
    %c0_i32_0 = arith.constant 0 : i32
    %c0_i32_1 = arith.constant 0 : i32
    return %c0_i32, %c0_i32_0, %arg0 : i32, i32, i32
  }
}

</mosaic_0001>

<bundles_post_ra>
// kernel: carafe3d_forward.3
= control target key start
LH: loop header
LB: loop body
LE: loop exit
PB: predicated region body
PF: predicated region fallthrough
CT: control target
= control target key end

     0   :  { %vm34_vm0 = vcmask 1043456   ;;  %vm30_vm1 = vcmask 31744   ;;  %v98_v3 = vmov 0   ;;  %s147_s0 = inlined_call_operand.vmem [shape: f32[4,128], index: 0, kind: input, shape index: {}]   ;;  %s148_s1 = inlined_call_operand.vmem [shape: f32[1,4], index: 1, kind: input, shape index: {}]   ;;  %s149_s3 = inlined_call_operand.vmem [shape: f32[4,4], index: 3, kind: input, shape index: {}]   ;;  %s150_s2 = inlined_call_operand.<no memory space> [shape: f32[1,1], index: 2, kind: input, shape index: {}]   ;;  %s151_s5 = inlined_call_operand.vmem [shape: f32[4,128], index: 5, kind: output, shape index: {1}]   ;;  %s152_s4 = inlined_call_operand.vmem [shape: f32[1,128], index: 4, kind: output, shape index: {0}]  }
   0x1   :  { %v21_v0 = vld [vmem:[%s147_s0] sm:$0xf]  ;;  %97 = vset.pattern.permute.xlu0 %v98_v3  ;;  %v11_v4 = vstv %s150_s2 }
   0x2   :  { %v22_v1 = vld [vmem:[%s148_s1] sm:$0x1]  ;;  %92 = vmatpush.msk.msra.mxu0 %vm34_vm0, %v21_v0  ;;  %94 = vmatpush.msk.msra.mxu1 %vm34_vm0, %v21_v0  ;;  %12 = vst [vmem:[#allocation2] sm:$0x1] %v11_v4 }
   0x3   :  { %v59_v2 = vld [vmem:[%s149_s3] sm:$0xf]  ;;  %93 = vmatmul.msk.f32.vlgmr.msra.gmra.mxu0 %vm30_vm1, %v22_v1 }
   0x4   :  { %95 = vmatmul.msk.f32.vlgmr.msra.gmra.mxu1 %vm30_vm1, %v59_v2 }
   0x9   :  { %v23_v5 = vld [vmem:[#allocation2] sm:$0x1] }
   0xa   :  { %26 = vperm.xlu0 %97, %v23_v5  }
  0x7c   :  { %v27_v6 = vpop.permute.xlu0 %26 }
  0x7d   :  { %v29_v7 = vperm.slane %v27_v6, 0 }
  0x80   :  { %v55_v8 = vpop.f32.mrf.mxu0 }
  0x81   :  { %v80_v9 = vpop.f32.mrf.mxu1  ;;  %v56_v10 = vadd.f32 %v55_v8, %v29_v7 }
  0x82   :  { %83 = vst [vmem:[%s151_s5] sm:$0xf] %v80_v9 }
  0x83   :  { %58 = vst [vmem:[%s152_s4] sm:$0x1] %v56_v10 }

// kernel: carafe3d_forward.4
= control target key start
LH: loop header
LB: loop body
LE: loop exit
PB: predicated region body
PF: predicated region fallthrough
CT: control target
= control target key end

     0   :  { %v466_v0 = vmov 0   ;;  %vm289_vm0 = vcmask 1042432   ;;  %vm207_vm1 = vcmask 220160   ;;  %s787_s2 = inlined_call_operand.vmem [shape: f32[216,1], index: 2, kind: input, shape index: {}]   ;;  %s788_s0 = inlined_call_operand.vmem [shape: f32[27,128], index: 0, kind: input, shape index: {}]   ;;  %s789_s1 = inlined_call_operand.vmem [shape: f32[216,27], index: 1, kind: input, shape index: {}]   ;;  %s790_s3 = inlined_call_operand.vmem [shape: f32[216,128], index: 3, kind: output, shape index: {}]  }
   0x1   :  { %465 = vset.pattern.permute.xlu2 %v466_v0  ;;  %464 = vset.pattern.permute.xlu1 %v466_v0  ;;  %v49_v1 = vld [vmem:[%s787_s2 + $0x20] sm:$0xff]  ;;  %v47_v2 = vld [vmem:[%s787_s2 + $0x10] sm:$0xff]  ;;  %v44_v4 = vld [vmem:[%s788_s0 + $0x18] sm:$0x7] }
   0x2   :  { %v45_v3 = vld [vmem:[%s787_s2] sm:$0xff]  ;;  %463 = vset.pattern.permute.xlu0 %v466_v0  ;;  %94 = vperm.xlu2 %465, %v49_v1   ;;  %v43_v5 = vld [vmem:[%s788_s0 + $0x10] sm:$0xff]  ;;  %v42_v6 = vld [vmem:[%s788_s0 + $0x8] sm:$0xff] }
   0x3   :  { %84 = vperm.xlu1 %464, %v47_v2   ;;  %74 = vperm.xlu0 %463, %v45_v3   ;;  %v41_v7 = vld [vmem:[%s788_s0] sm:$0xff]  ;;  %v21_v9 = vld [vmem:[%s789_s1 + $0x38] sm:$0xff]  ;;  %v28_v10 = vld [vmem:[%s789_s1 + $0x70] sm:$0xff] }
   0x4   :  { %422 = vmatpush.msk.msra.mxu0 %vm289_vm0, %v44_v4  ;;  %450 = vmatpush.msk.msra.mxu1 %vm289_vm0, %v44_v4  ;;  %v14_v8 = vld [vmem:[%s789_s1] sm:$0xff]  ;;  %v35_v11 = vld [vmem:[%s789_s1 + $0xa8] sm:$0xff]  ;;  %v48_v13 = vld [vmem:[%s787_s2 + $0x18] sm:$0xff] }
   0x5   :  { %451 = vmatpush.msk.msra.mxu2 %vm289_vm0, %v44_v4  ;;  %452 = vmatpush.msk.msra.mxu3 %vm289_vm0, %v44_v4  ;;  %v50_v12 = vld [vmem:[%s787_s2 + $0x28] sm:$0xff]  ;;  %v22_v16 = vld [vmem:[%s789_s1 + $0x40] sm:$0xff]  ;;  %v29_v17 = vld [vmem:[%s789_s1 + $0x78] sm:$0xff] }
   0x6   :  { %306 = vmatpush.msra.mxu0 %v43_v5  ;;  %453 = vmatpush.msra.mxu1 %v43_v5  ;;  %v46_v14 = vld [vmem:[%s787_s2 + $0x8] sm:$0xff]  ;;  %v36_v18 = vld [vmem:[%s789_s1 + $0xb0] sm:$0xff]  ;;  %v53_v19 = vld [vmem:[%s787_s2 + $0x40] sm:$0xff] }
   0x7   :  { %454 = vmatpush.msra.mxu2 %v43_v5  ;;  %455 = vmatpush.msra.mxu3 %v43_v5  ;;  %v15_v15 = vld [vmem:[%s789_s1 + $0x8] sm:$0xff]  ;;  %v52_v20 = vld [vmem:[%s787_s2 + $0x38] sm:$0xff]  ;;  %v51_v21 = vld [vmem:[%s787_s2 + $0x30] sm:$0xff] }
   0x8   :  { %307 = vmatpush.msra.mxu0 %v42_v6  ;;  %456 = vmatpush.msra.mxu1 %v42_v6  ;;  %v16_v22 = vld [vmem:[%s789_s1 + $0x10] sm:$0xff]  ;;  %v23_v23 = vld [vmem:[%s789_s1 + $0x48] sm:$0xff]  ;;  %v30_v24 = vld [vmem:[%s789_s1 + $0x80] sm:$0xff] }
   0x9   :  { %457 = vmatpush.msra.mxu2 %v42_v6  ;;  %458 = vmatpush.msra.mxu3 %v42_v6  ;;  %v37_v25 = vld [vmem:[%s789_s1 + $0xb8] sm:$0xff]  ;;  %v55_v27 = vld [vmem:[%s787_s2 + $0x50] sm:$0xff]  ;;  %v54_v28 = vld [vmem:[%s787_s2 + $0x48] sm:$0xff] }
   0xa   :  { %308 = vmatpush.msra.mxu0 %v41_v7  ;;  %459 = vmatpush.msra.mxu1 %v41_v7  ;;  %v56_v26 = vld [vmem:[%s787_s2 + $0x58] sm:$0xff]  ;;  %v24_v30 = vld [vmem:[%s789_s1 + $0x50] sm:$0xff]  ;;  %v31_v31 = vld [vmem:[%s789_s1 + $0x88] sm:$0xff] }
   0xb   :  { %460 = vmatpush.msra.mxu2 %v41_v7  ;;  %461 = vmatpush.msra.mxu3 %v41_v7  ;;  %v17_v29 = vld [vmem:[%s789_s1 + $0x18] sm:$0xff]  ;;  %v38_v32 = vld [vmem:[%s789_s1 + $0xc0] sm:$0xff]  ;;  %v59_v33 = vld [vmem:[%s787_s2 + $0x70] sm:$0xff] }
   0xc   :  { %423 = vmatmul.msk.f32.vlgmr.msra.gmra.mxu0 %vm207_vm1, %v14_v8  ;;  %430 = vmatmul.msk.f32.vlgmr.msra.gmra.mxu1 %vm207_vm1, %v21_v9  ;;  %v58_v34 = vld [vmem:[%s787_s2 + $0x68] sm:$0xff]  ;;  %v57_v35 = vld [vmem:[%s787_s2 + $0x60] sm:$0xff]  ;;  %v25_v37 = vld [vmem:[%s789_s1 + $0x58] sm:$0xff] }
   0xd   :  { %437 = vmatmul.msk.f32.vlgmr.msra.gmra.mxu2 %vm207_vm1, %v28_v10  ;;  %444 = vmatmul.msk.f32.vlgmr.msra.gmra.mxu3 %vm207_vm1, %v35_v11  ;;  %v18_v36 = vld [vmem:[%s789_s1 + $0x20] sm:$0xff]  ;;  %v32_v38 = vld [vmem:[%s789_s1 + $0x90] sm:$0xff]  ;;  %v39_v39 = vld [vmem:[%s789_s1 + $0xc8] sm:$0xff] }
   0xe   :  { %99 = vperm.xlu2 %465, %v50_v12   ;;  %89 = vperm.xlu1 %464, %v48_v13   ;;  %v62_v40 = vld [vmem:[%s787_s2 + $0x88] sm:$0xff]  ;;  %v61_v41 = vld [vmem:[%s787_s2 + $0x80] sm:$0xff]  ;;  %v60_v42 = vld [vmem:[%s787_s2 + $0x78] sm:$0xff] }
   0xf   :  { %79 = vperm.xlu0 %463, %v46_v14   ;;  %v19_v43 = vld [vmem:[%s789_s1 + $0x28] sm:$0xff]  ;;  %v26_v44 = vld [vmem:[%s789_s1 + $0x60] sm:$0xff]  ;;  %v33_v45 = vld [vmem:[%s789_s1 + $0x98] sm:$0xff] }
  0x10   :  { %v40_v46 = vld [vmem:[%s789_s1 + $0xd0] sm:$0xff]  ;;  %v65_v47 = vld [vmem:[%s787_s2 + $0xa0] sm:$0xff]  ;;  %v64_v48 = vld [vmem:[%s787_s2 + $0x98] sm:$0xff] }
  0x11   :  { %v63_v49 = vld [vmem:[%s787_s2 + $0x90] sm:$0xff]  ;;  %v27_v51 = vld [vmem:[%s789_s1 + $0x68] sm:$0xff]  ;;  %v34_v52 = vld [vmem:[%s789_s1 + $0xa0] sm:$0xff] }
  0x12   :  { %v20_v50 = vld [vmem:[%s789_s1 + $0x30] sm:$0xff]  ;;  %v68_v53 = vld [vmem:[%s787_s2 + $0xb8] sm:$0xff]  ;;  %v66_v55 = vld [vmem:[%s787_s2 + $0xa8] sm:$0xff] }
  0x13   :  { %v67_v54 = vld [vmem:[%s787_s2 + $0xb0] sm:$0xff]  ;;  %v70_v57 = vld [vmem:[%s787_s2 + $0xc8] sm:$0xff]  ;;  %v69_v58 = vld [vmem:[%s787_s2 + $0xc0] sm:$0xff] }
  0x14   :  { %424 = vmatmul.msk.f32.gmra.mxu0 %vm207_vm1, %v15_v15  ;;  %431 = vmatmul.msk.f32.gmra.mxu1 %vm207_vm1, %v22_v16  ;;  %v71_v56 = vld [vmem:[%s787_s2 + $0xd0] sm:$0xff] }
  0x15   :  { %438 = vmatmul.msk.f32.gmra.mxu2 %vm207_vm1, %v29_v17  ;;  %445 = vmatmul.msk.f32.gmra.mxu3 %vm207_vm1, %v36_v18 }
  0x16   :  { %114 = vperm.xlu2 %465, %v53_v19   ;;  %109 = vperm.xlu1 %464, %v52_v20  }
  0x17   :  { %104 = vperm.xlu0 %463, %v51_v21  }
  0x1c   :  { %425 = vmatmul.msk.f32.gmra.mxu0 %vm207_vm1, %v16_v22  ;;  %432 = vmatmul.msk.f32.gmra.mxu1 %vm207_vm1, %v23_v23 }
  0x1d   :  { %439 = vmatmul.msk.f32.gmra.mxu2 %vm207_vm1, %v30_v24  ;;  %446 = vmatmul.msk.f32.gmra.mxu3 %vm207_vm1, %v37_v25 }
  0x1e   :  { %129 = vperm.xlu2 %465, %v56_v26   ;;  %124 = vperm.xlu1 %464, %v55_v27  }
  0x1f   :  { %119 = vperm.xlu0 %463, %v54_v28  }
  0x24   :  { %426 = vmatmul.msk.f32.gmra.mxu0 %vm207_vm1, %v17_v29  ;;  %433 = vmatmul.msk.f32.gmra.mxu1 %vm207_vm1, %v24_v30 }
  0x25   :  { %440 = vmatmul.msk.f32.gmra.mxu2 %vm207_vm1, %v31_v31  ;;  %447 = vmatmul.msk.f32.gmra.mxu3 %vm207_vm1, %v38_v32 }
  0x26   :  { %144 = vperm.xlu2 %465, %v59_v33   ;;  %139 = vperm.xlu1 %464, %v58_v34  }
  0x27   :  { %134 = vperm.xlu0 %463, %v57_v35  }
  0x2c   :  { %427 = vmatmul.msk.f32.gmra.mxu0 %vm207_vm1, %v18_v36  ;;  %434 = vmatmul.msk.f32.gmra.mxu1 %vm207_vm1, %v25_v37 }
  0x2d   :  { %441 = vmatmul.msk.f32.gmra.mxu2 %vm207_vm1, %v32_v38  ;;  %448 = vmatmul.msk.f32.gmra.mxu3 %vm207_vm1, %v39_v39 }
  0x2e   :  { %159 = vperm.xlu2 %465, %v62_v40   ;;  %154 = vperm.xlu1 %464, %v61_v41  }
  0x2f   :  { %149 = vperm.xlu0 %463, %v60_v42  }
  0x34   :  { %428 = vmatmul.msk.f32.gmra.mxu0 %vm207_vm1, %v19_v43  ;;  %435 = vmatmul.msk.f32.gmra.mxu1 %vm207_vm1, %v26_v44 }
  0x35   :  { %442 = vmatmul.msk.f32.gmra.mxu2 %vm207_vm1, %v33_v45  ;;  %449 = vmatmul.msk.f32.gmra.mxu3 %vm207_vm1, %v40_v46 }
  0x36   :  { %174 = vperm.xlu2 %465, %v65_v47   ;;  %169 = vperm.xlu1 %464, %v64_v48  }
  0x37   :  { %164 = vperm.xlu0 %463, %v63_v49  }
  0x3c   :  { %429 = vmatmul.msk.f32.gmra.mxu0 %vm207_vm1, %v20_v50  ;;  %436 = vmatmul.msk.f32.gmra.mxu1 %vm207_vm1, %v27_v51 }
  0x3d   :  { %443 = vmatmul.msk.f32.gmra.mxu2 %vm207_vm1, %v34_v52 }
  0x3e   :  { %189 = vperm.xlu2 %465, %v68_v53   ;;  %184 = vperm.xlu1 %464, %v67_v54  }
  0x3f   :  { %179 = vperm.xlu0 %463, %v66_v55  }
  0x46   :  { %204 = vperm.xlu2 %465, %v71_v56   ;;  %199 = vperm.xlu1 %464, %v70_v57  }
  0x47   :  { %194 = vperm.xlu0 %463, %v69_v58  }
  0x5c   :  { %v688_v59 = vpop.permute.xlu2 %94 }
  0x68   :  { %v690_v60 = vpop.permute.xlu2 %99 }
  0x70   :  { %v115_v61 = vpop.permute.xlu2 %114 }
  0x75   :  { %v85_v62 = vpop.permute.xlu1 %84  ;;  %v75_v63 = vpop.permute.xlu0 %74 }
  0x78   :  { %v692_v0 = vpop.permute.xlu2 %129 }
  0x80   :  { %v90_v1 = vpop.permute.xlu1 %89  ;;  %v145_v3 = vpop.permute.xlu2 %144 }
  0x81   :  { %v80_v2 = vpop.permute.xlu0 %79 }
  0x88   :  { %v110_v4 = vpop.permute.xlu1 %109  ;;  %v160_v10 = vpop.permute.xlu2 %159 }
  0x89   :  { %v694_v5 = vpop.permute.xlu0 %104  ;;  %v310_v6 = vpop.f32.mrf.mxu0 }
  0x8a   :  { %v311_v7 = vadd.f32 %v310_v6, %v75_v63  ;;  %v331_v8 = vpop.f32.mrf.mxu1 }
  0x8b   :  { %v332_v9 = vadd.f32 %v331_v8, %v110_v4 }
  0x8c   :  { %391 = vst [vmem:[%s790_s3] sm:$0xff] %v311_v7 }
  0x8d   :  { %398 = vst [vmem:[%s790_s3 + $0x38] sm:$0xff] %v332_v9 }
  0x90   :  { %v125_v11 = vpop.permute.xlu1 %124  ;;  %v352_v13 = vpop.f32.mrf.mxu2 }
  0x91   :  { %v120_v12 = vpop.permute.xlu0 %119  ;;  %v353_v14 = vadd.f32 %v352_v13, %v145_v3  ;;  %v373_v15 = vpop.f32.mrf.mxu3 }
  0x92   :  { %v313_v16 = vpop.f32.mrf.mxu0  ;;  %v334_v18 = vpop.f32.mrf.mxu1 }
  0x93   :  { %v314_v17 = vadd.f32 %v313_v16, %v80_v2  ;;  %405 = vst [vmem:[%s790_s3 + $0x70] sm:$0xff] %v353_v14  ;;  %v335_v19 = vadd.f32 %v334_v18, %v115_v61  ;;  %v708_v20 = vpop.permute.xlu2 %174 }
  0x95   :  { %392 = vst [vmem:[%s790_s3 + $0x8] sm:$0xff] %v314_v17 }
  0x96   :  { %399 = vst [vmem:[%s790_s3 + $0x40] sm:$0xff] %v335_v19 }
  0x98   :  { %v713_v21 = vpop.permute.xlu1 %139  ;;  %v355_v23 = vpop.f32.mrf.mxu2 }
  0x99   :  { %v135_v22 = vpop.permute.xlu0 %134  ;;  %v376_v24 = vpop.f32.mrf.mxu3 }
  0x9a   :  { %v316_v25 = vpop.f32.mrf.mxu0  ;;  %v337_v27 = vpop.f32.mrf.mxu1 }
  0x9b   :  { %v317_v26 = vadd.f32 %v316_v25, %v85_v62  ;;  %v338_v28 = vadd.f32 %v337_v27, %v120_v12  ;;  %v190_v29 = vpop.permute.xlu2 %189 }
  0x9d   :  { %393 = vst [vmem:[%s790_s3 + $0x10] sm:$0xff] %v317_v26 }
  0x9e   :  { %400 = vst [vmem:[%s790_s3 + $0x48] sm:$0xff] %v338_v28 }
  0xa0   :  { %v155_v30 = vpop.permute.xlu1 %154  ;;  %v358_v32 = vpop.f32.mrf.mxu2 }
  0xa1   :  { %v150_v31 = vpop.permute.xlu0 %149  ;;  %v359_v34 = vadd.f32 %v358_v32, %v155_v30  ;;  %v379_v35 = vpop.f32.mrf.mxu3 }
  0xa2   :  { %v356_v33 = vadd.f32 %v355_v23, %v150_v31  ;;  %v319_v36 = vpop.f32.mrf.mxu0  ;;  %v380_v37 = vadd.f32 %v379_v35, %v190_v29  ;;  %v340_v39 = vpop.f32.mrf.mxu1 }
  0xa3   :  { %v320_v38 = vadd.f32 %v319_v36, %v90_v1  ;;  %v341_v40 = vadd.f32 %v340_v39, %v125_v11  ;;  %407 = vst [vmem:[%s790_s3 + $0x80] sm:$0xff] %v359_v34  ;;  %v205_v62 = vpop.permute.xlu2 %204 }
  0xa4   :  { %406 = vst [vmem:[%s790_s3 + $0x78] sm:$0xff] %v356_v33 }
  0xa5   :  { %414 = vst [vmem:[%s790_s3 + $0xb8] sm:$0xff] %v380_v37 }
  0xa6   :  { %394 = vst [vmem:[%s790_s3 + $0x18] sm:$0xff] %v320_v38 }
  0xa7   :  { %401 = vst [vmem:[%s790_s3 + $0x50] sm:$0xff] %v341_v40 }
  0xa8   :  { %v170_v41 = vpop.permute.xlu1 %169  ;;  %v361_v43 = vpop.f32.mrf.mxu2 }
  0xa9   :  { %v165_v42 = vpop.permute.xlu0 %164  ;;  %v362_v44 = vadd.f32 %v361_v43, %v160_v10  ;;  %v382_v45 = vpop.f32.mrf.mxu3 }
  0xaa   :  { %v322_v46 = vpop.f32.mrf.mxu0  ;;  %v343_v48 = vpop.f32.mrf.mxu1 }
  0xab   :  { %v323_v47 = vadd.f32 %v322_v46, %v688_v59  ;;  %408 = vst [vmem:[%s790_s3 + $0x88] sm:$0xff] %v362_v44  ;;  %v344_v49 = vadd.f32 %v343_v48, %v692_v0 }
  0xad   :  { %395 = vst [vmem:[%s790_s3 + $0x20] sm:$0xff] %v323_v47 }
  0xae   :  { %402 = vst [vmem:[%s790_s3 + $0x58] sm:$0xff] %v344_v49 }
  0xb0   :  { %v185_v50 = vpop.permute.xlu1 %184  ;;  %v364_v53 = vpop.f32.mrf.mxu2 }
  0xb1   :  { %v377_v51 = vadd.f32 %v376_v24, %v185_v50  ;;  %v180_v52 = vpop.permute.xlu0 %179  ;;  %v365_v55 = vadd.f32 %v364_v53, %v165_v42  ;;  %v385_v56 = vpop.f32.mrf.mxu3 }
  0xb2   :  { %v374_v54 = vadd.f32 %v373_v15, %v180_v52  ;;  %v325_v57 = vpop.f32.mrf.mxu0  ;;  %v346_v59 = vpop.f32.mrf.mxu1 }
  0xb3   :  { %413 = vst [vmem:[%s790_s3 + $0xb0] sm:$0xff] %v377_v51  ;;  %v326_v58 = vadd.f32 %v325_v57, %v690_v60  ;;  %v347_v61 = vadd.f32 %v346_v59, %v135_v22 }
  0xb4   :  { %412 = vst [vmem:[%s790_s3 + $0xa8] sm:$0xff] %v374_v54 }
  0xb5   :  { %409 = vst [vmem:[%s790_s3 + $0x90] sm:$0xff] %v365_v55 }
  0xb6   :  { %396 = vst [vmem:[%s790_s3 + $0x28] sm:$0xff] %v326_v58 }
  0xb7   :  { %403 = vst [vmem:[%s790_s3 + $0x60] sm:$0xff] %v347_v61 }
  0xb8   :  { %v200_v60 = vpop.permute.xlu1 %199  ;;  %v367_v1 = vpop.f32.mrf.mxu2 }
  0xb9   :  { %v386_v63 = vadd.f32 %v385_v56, %v200_v60  ;;  %v195_v0 = vpop.permute.xlu0 %194  ;;  %v368_v3 = vadd.f32 %v367_v1, %v170_v41  ;;  %v388_v4 = vpop.f32.mrf.mxu3 }
  0xba   :  { %v383_v2 = vadd.f32 %v382_v45, %v195_v0  ;;  %v328_v6 = vpop.f32.mrf.mxu0  ;;  %v389_v7 = vadd.f32 %v388_v4, %v205_v62  ;;  %v349_v9 = vpop.f32.mrf.mxu1 }
  0xbb   :  { %416 = vst [vmem:[%s790_s3 + $0xc8] sm:$0xff] %v386_v63  ;;  %v329_v8 = vadd.f32 %v328_v6, %v694_v5  ;;  %v350_v10 = vadd.f32 %v349_v9, %v713_v21 }
  0xbc   :  { %415 = vst [vmem:[%s790_s3 + $0xc0] sm:$0xff] %v383_v2 }
  0xbd   :  { %410 = vst [vmem:[%s790_s3 + $0x98] sm:$0xff] %v368_v3 }
  0xbe   :  { %417 = vst [vmem:[%s790_s3 + $0xd0] sm:$0xff] %v389_v7 }
  0xbf   :  { %397 = vst [vmem:[%s790_s3 + $0x30] sm:$0xff] %v329_v8 }
  0xc0   :  { %404 = vst [vmem:[%s790_s3 + $0x68] sm:$0xff] %v350_v10  ;;  %v370_v5 = vpop.f32.mrf.mxu2 }
  0xc1   :  { %v371_v11 = vadd.f32 %v370_v5, %v708_v20 }
  0xc3   :  { %411 = vst [vmem:[%s790_s3 + $0xa0] sm:$0xff] %v371_v11 }

// kernel: carafe3d_forward.5
= control target key start
LH: loop header
LB: loop body
LE: loop exit
PB: predicated region body
PF: predicated region fallthrough
CT: control target
= control target key end

     0   :  { %v954_v0 = vmov 0   ;;  %s1681_s2 = inlined_call_operand.vmem [shape: f32[4,1,1], index: 2, kind: input, shape index: {}]   ;;  %s1682_s1 = inlined_call_operand.vmem [shape: f32[27,8,128], index: 1, kind: input, shape index: {}]   ;;  %s1683_s0 = inlined_call_operand.vmem [shape: f32[27,4,128], index: 0, kind: input, shape index: {}]   ;;  %s1684_s3 = inlined_call_operand.vmem [shape: f32[4,8,128], index: 3, kind: output, shape index: {}]  }
   0x1   :  { %893 = vset.pattern.permute.xlu1 %v954_v0  ;;  %892 = vset.pattern.permute.xlu0 %v954_v0  ;;  %v894_v1 = vld [vmem:[%s1681_s2 + $0x2] ss:$0 sm:$0xff]  ;;  %v895_v2 = vld [vmem:[%s1681_s2] ss:$0 sm:$0xff]  ;;  %v989_v4 = vld [vmem:[%s1682_s1 + $0x8] sm:$0xff] }
   0x2   :  { %820 = vperm.xlu1 %893, %v894_v1   ;;  %v984_v3 = vld [vmem:[%s1682_s1] sm:$0xff]  ;;  %812 = vperm.xlu0 %892, %v895_v2   ;;  %v994_v5 = vld [vmem:[%s1682_s1 + $0x10] sm:$0xff]  ;;  %v1001_v7 = vld [vmem:[%s1682_s1 + $0x18] sm:$0xff] }
   0x3   :  { %v17_v6 = vmax.f32 %v984_v3, %v989_v4  ;;  %v896_v8 = vld [vmem:[%s1681_s2 + $0x3] ss:$0 sm:$0xff]  ;;  %v897_v10 = vld [vmem:[%s1681_s2 + $0x1] ss:$0 sm:$0xff]  ;;  %v1019_v13 = vld [vmem:[%s1682_s1 + $0x28] sm:$0xff] }
   0x4   :  { %v1013_v11 = vld [vmem:[%s1682_s1 + $0x20] sm:$0xff]  ;;  %v1025_v15 = vld [vmem:[%s1682_s1 + $0x30] sm:$0xff]  ;;  %v1031_v17 = vld [vmem:[%s1682_s1 + $0x38] sm:$0xff] }
   0x5   :  { %v20_v9 = vmax.f32 %v17_v6, %v994_v5  ;;  %v1037_v19 = vld [vmem:[%s1682_s1 + $0x40] sm:$0xff]  ;;  %v1043_v21 = vld [vmem:[%s1682_s1 + $0x48] sm:$0xff]  ;;  %v1049_v23 = vld [vmem:[%s1682_s1 + $0x50] sm:$0xff] }
   0x6   :  { %v1055_v25 = vld [vmem:[%s1682_s1 + $0x58] sm:$0xff]  ;;  %v1061_v27 = vld [vmem:[%s1682_s1 + $0x60] sm:$0xff]  ;;  %v1067_v29 = vld [vmem:[%s1682_s1 + $0x68] sm:$0xff] }
   0x7   :  { %v23_v12 = vmax.f32 %v20_v9, %v1001_v7  ;;  %v1073_v31 = vld [vmem:[%s1682_s1 + $0x70] sm:$0xff]  ;;  %v1079_v33 = vld [vmem:[%s1682_s1 + $0x78] sm:$0xff]  ;;  %v1085_v35 = vld [vmem:[%s1682_s1 + $0x80] sm:$0xff] }
   0x8   :  { %v1091_v37 = vld [vmem:[%s1682_s1 + $0x88] sm:$0xff]  ;;  %v1097_v39 = vld [vmem:[%s1682_s1 + $0x90] sm:$0xff]  ;;  %v1103_v41 = vld [vmem:[%s1682_s1 + $0x98] sm:$0xff] }
   0x9   :  { %v26_v14 = vmax.f32 %v23_v12, %v1013_v11  ;;  %v1109_v43 = vld [vmem:[%s1682_s1 + $0xa0] sm:$0xff]  ;;  %v1115_v45 = vld [vmem:[%s1682_s1 + $0xa8] sm:$0xff]  ;;  %v1121_v47 = vld [vmem:[%s1682_s1 + $0xb0] sm:$0xff] }
   0xa   :  { %824 = vperm.xlu1 %893, %v896_v8   ;;  %816 = vperm.xlu0 %892, %v897_v10   ;;  %v1127_v49 = vld [vmem:[%s1682_s1 + $0xb8] sm:$0xff]  ;;  %v1133_v51 = vld [vmem:[%s1682_s1 + $0xc0] sm:$0xff]  ;;  %v1149_v55 = vld [vmem:[%s1683_s0 + $0x8] sm:$0xf] }
   0xb   :  { %v29_v16 = vmax.f32 %v26_v14, %v1019_v13  ;;  %v1138_v52 = vld [vmem:[%s1683_s0] sm:$0xf]  ;;  %v1143_v53 = vld [vmem:[%s1683_s0 + $0x4] sm:$0xf]  ;;  %1753 = vst [vmem:[#allocation5_spill] sm:$0xff] %v1149_v55  ;;  %v1159_v57 = vld [vmem:[%s1682_s1 + $0xc8] sm:$0xff] }
   0xc   :  { %1751 = vst [vmem:[#allocation3_spill] sm:$0xff] %v1138_v52  ;;  %v1154_v56 = vld [vmem:[%s1683_s0 + $0xc] sm:$0xf]  ;;  %v100_v59 = vrot.slane %v1138_v52, 2  ;;  %v126_v60 = vrot.slane %v1143_v53, 2  ;;  %v1167_v61 = vld [vmem:[%s1682_s1 + $0xd0] sm:$0xff] }
   0xd   :  { %v32_v18 = vmax.f32 %v29_v16, %v1025_v15  ;;  %1752 = vst [vmem:[#allocation4_spill] sm:$0xff] %v1143_v53  ;;  %v152_v62 = vrot.slane %v1149_v55, 2  ;;  %v178_v63 = vrot.slane %v1154_v56, 2  ;;  %v1175_v1 = vld [vmem:[%s1683_s0 + $0x10] sm:$0xf] }
   0xe   :  { %1754 = vst [vmem:[#allocation6_spill] sm:$0xff] %v1154_v56  ;;  %v104_v6 = vperm.slane %v100_v59, 0  ;;  %v130_v8 = vperm.slane %v126_v60, 0  ;;  %v204_v12 = vrot.slane %v1175_v1, 2 }
   0xf   :  { %v35_v20 = vmax.f32 %v32_v18, %v1031_v17  ;;  %1755 = vst [vmem:[#allocation7_spill] sm:$0xff] %v1175_v1  ;;  %v1180_v9 = vperm.slane %v152_v62, 0  ;;  %v1182_v10 = vperm.slane %v178_v63, 0 }
  0x11   :  { %v38_v22 = vmax.f32 %v35_v20, %v1037_v19 }
  0x13   :  { %v41_v24 = vmax.f32 %v38_v22, %v1043_v21 }
  0x15   :  { %v44_v26 = vmax.f32 %v41_v24, %v1049_v23  ;;  %v1197_v24 = vld [vmem:[%s1683_s0 + $0x14] sm:$0xf] }
  0x16   :  { %1756 = vst [vmem:[#allocation8_spill] sm:$0xff] %v1197_v24 }
  0x17   :  { %v47_v28 = vmax.f32 %v44_v26, %v1055_v25 }
  0x19   :  { %v50_v30 = vmax.f32 %v47_v28, %v1061_v27 }
  0x1b   :  { %v53_v32 = vmax.f32 %v50_v30, %v1067_v29 }
  0x1d   :  { %v56_v34 = vmax.f32 %v53_v32, %v1073_v31 }
  0x1f   :  { %v59_v36 = vmax.f32 %v56_v34, %v1079_v33 }
  0x21   :  { %v62_v38 = vmax.f32 %v59_v36, %v1085_v35  ;;  %v230_v36 = vrot.slane %v1197_v24, 2 }
  0x23   :  { %v65_v40 = vmax.f32 %v62_v38, %v1091_v37  ;;  %v1224_v38 = vld [vmem:[%s1683_s0 + $0x24] sm:$0xf]  ;;  %v234_v62 = vperm.slane %v230_v36, 0 }
  0x24   :  { %v334_v59 = vrot.slane %v1224_v38, 2 }
  0x25   :  { %v68_v42 = vmax.f32 %v65_v40, %v1097_v39 }
  0x27   :  { %v71_v44 = vmax.f32 %v68_v42, %v1103_v41 }
  0x29   :  { %v74_v46 = vmax.f32 %v71_v44, %v1109_v43 }
  0x2b   :  { %v77_v48 = vmax.f32 %v74_v46, %v1115_v45  ;;  %v1232_v46 = vld [vmem:[%s1683_s0 + $0x28] sm:$0xf] }
  0x2c   :  { %v360_v63 = vrot.slane %v1232_v46, 2 }
  0x2d   :  { %v80_v50 = vmax.f32 %v77_v48, %v1121_v47 }
  0x2f   :  { %v83_v54 = vmax.f32 %v80_v50, %v1127_v49 }
  0x31   :  { %v86_v58 = vmax.f32 %v83_v54, %v1133_v51 }
  0x33   :  { %v89_v0 = vmax.f32 %v86_v58, %v1159_v57 }
  0x35   :  { %v1178_v2 = vmax.f32 %v89_v0, %v1167_v61 }
  0x37   :  { %v93_v16 = vsub.f32 %v984_v3, %v1178_v2  ;;  %v118_v18 = vsub.f32 %v989_v4, %v1178_v2  ;;  %v144_v20 = vsub.f32 %v994_v5, %v1178_v2  ;;  %v170_v22 = vsub.f32 %v1001_v7, %v1178_v2  ;;  %v1204_v3 = vld [vmem:[%s1683_s0 + $0x18] sm:$0xf]  ;;  %v1209_v4 = vld [vmem:[%s1683_s0 + $0x1c] sm:$0xf]  ;;  %v1214_v5 = vld [vmem:[%s1683_s0 + $0x20] sm:$0xf] }
  0x38   :  { %v196_v26 = vsub.f32 %v1013_v11, %v1178_v2  ;;  %1757 = vst [vmem:[#allocation9_spill] sm:$0xff] %v1204_v3  ;;  %v1216_v11 = vperm.slane %v204_v12, 0  ;;  %v222_v34 = vsub.f32 %v1019_v13, %v1178_v2  ;;  %v256_v40 = vrot.slane %v1204_v3, 2 }
  0x39   :  { %1758 = vst [vmem:[#allocation10_spill] sm:$0xff] %v1209_v4  ;;  %v94_v7 = vmul.f32 1.442695, %v93_v16  ;;  %v119_v28 = vmul.f32 1.442695, %v118_v18  ;;  %v282_v42 = vrot.slane %v1209_v4, 2  ;;  %v248_v48 = vsub.f32 %v1025_v15, %v1178_v2 }
  0x3a   :  { %v145_v30 = vmul.f32 1.442695, %v144_v20  ;;  %v171_v32 = vmul.f32 1.442695, %v170_v22  ;;  %v308_v44 = vrot.slane %v1214_v5, 2  ;;  %v274_v50 = vsub.f32 %v1031_v17, %v1178_v2 }
  0x3b   :  { %898 = vpow2.f32 %v94_v7  ;;  %v197_v13 = vmul.f32 1.442695, %v196_v26  ;;  %v300_v54 = vsub.f32 %v1037_v19, %v1178_v2  ;;  %v326_v58 = vsub.f32 %v1043_v21, %v1178_v2  ;;  %v1247_v15 = vld [vmem:[%s1683_s0 + $0x2c] sm:$0xf]  ;;  %v1260_v20 = vld [vmem:[%s1683_s0 + $0x30] sm:$0xf] }
  0x3c   :  { %900 = vpow2.f32 %v119_v28  ;;  %v223_v60 = vmul.f32 1.442695, %v222_v34  ;;  %1759 = vst [vmem:[#allocation11_spill] sm:$0xff] %v1247_v15  ;;  %v260_v17 = vperm.slane %v256_v40, 0  ;;  %v1249_v0 = vperm.slane %v282_v42, 0 }
  0x3d   :  { %902 = vpow2.f32 %v145_v30  ;;  %v1251_v12 = vperm.slane %v308_v44, 0  ;;  %v352_v19 = vsub.f32 %v1049_v23, %v1178_v2  ;;  %v249_v21 = vmul.f32 1.442695, %v248_v48  ;;  %1760 = vst [vmem:[#allocation12_spill] sm:$0xff] %v1260_v20 }
  0x3e   :  { %904 = vpow2.f32 %v171_v32  ;;  %v275_v16 = vmul.f32 1.442695, %v274_v50  ;;  %v378_v18 = vsub.f32 %v1055_v25, %v1178_v2  ;;  %v301_v26 = vmul.f32 1.442695, %v300_v54 }
  0x3f   :  { %906 = vpow2.f32 %v197_v13  ;;  %v327_v7 = vmul.f32 1.442695, %v326_v58  ;;  %v1264_v28 = vperm.slane %v334_v59, 0  ;;  %v386_v30 = vrot.slane %v1247_v15, 2 }
  0x40   :  { %908 = vpow2.f32 %v223_v60  ;;  %v1270_v34 = vperm.slane %v360_v63, 0  ;;  %v404_v25 = vsub.f32 %v1061_v27, %v1178_v2  ;;  %v353_v44 = vmul.f32 1.442695, %v352_v19 }
  0x41   :  { %v1262_v22 = vpop.eup %898  ;;  %v412_v13 = vrot.slane %v1260_v20, 2  ;;  %910 = vpow2.f32 %v249_v21  ;;  %v379_v50 = vmul.f32 1.442695, %v378_v18  ;;  %v430_v54 = vsub.f32 %v1067_v29, %v1178_v2 }
  0x42   :  { %1761 = vst [vmem:[#allocation13_spill] sm:$0xff] %v1262_v22  ;;  %v1267_v23 = vpop.eup %900  ;;  %v112_v32 = vmul.f32 %v1262_v22, %v104_v6  ;;  %v1283_v6 = vld [vmem:[%s1683_s0 + $0x34] sm:$0xf]  ;;  %v1294_v60 = vperm.slane %v386_v30, 0  ;;  %912 = vpow2.f32 %v275_v16  ;;  %v405_v19 = vmul.f32 1.442695, %v404_v25 }
  0x43   :  { %v1274_v36 = vpop.eup %902  ;;  %v121_v40 = vadd.f32 %v1267_v23, %v1262_v22  ;;  %v138_v42 = vmul.f32 %v1267_v23, %v130_v8  ;;  %1763 = vst [vmem:[#allocation15_spill] sm:$0xff] %v1283_v6  ;;  %v438_v14 = vrot.slane %v1283_v6, 2  ;;  %914 = vpow2.f32 %v301_v26 }
  0x44   :  { %1762 = vst [vmem:[#allocation14_spill] sm:$0xff] %v1274_v36  ;;  %v1285_v48 = vpop.eup %904  ;;  %v164_v27 = vmul.f32 %v1274_v36, %v1180_v9  ;;  %v456_v9 = vsub.f32 %v1073_v31, %v1178_v2  ;;  %916 = vpow2.f32 %v327_v7  ;;  %v416_v16 = vperm.slane %v412_v13, 0 }
  0x45   :  { %1764 = vst [vmem:[#allocation16_spill] sm:$0xff] %v1285_v48  ;;  %v142_v58 = vadd.f32 %v138_v42, %v112_v32  ;;  %v147_v8 = vadd.f32 %v1274_v36, %v121_v40  ;;  %v190_v59 = vmul.f32 %v1285_v48, %v1182_v10  ;;  %v1296_v63 = vpop.eup %906  ;;  %v1307_v10 = vld [vmem:[%s1683_s0 + $0x38] sm:$0xf]  ;;  %v431_v32 = vmul.f32 1.442695, %v430_v54 }
  0x46   :  { %v216_v18 = vmul.f32 %v1296_v63, %v1216_v11  ;;  %1765 = vst [vmem:[#allocation17_spill] sm:$0xff] %v1307_v10  ;;  %v1309_v30 = vpop.eup %908  ;;  %v482_v31 = vsub.f32 %v1079_v33, %v1178_v2  ;;  %v1318_v11 = vld [vmem:[%s1683_s0 + $0x3c] sm:$0xf]  ;;  %v508_v26 = vsub.f32 %v1085_v35, %v1178_v2  ;;  %918 = vpow2.f32 %v353_v44 }
  0x47   :  { %v168_v21 = vadd.f32 %v164_v27, %v142_v58  ;;  %v173_v29 = vadd.f32 %v1285_v48, %v147_v8  ;;  %v242_v42 = vmul.f32 %v1309_v30, %v234_v62  ;;  %1766 = vst [vmem:[#allocation18_spill] sm:$0xff] %v1318_v11  ;;  %v1322_v27 = vpop.eup %910  ;;  %v442_v7 = vperm.slane %v438_v14, 0  ;;  %v1330_v8 = vld [vmem:[%s1683_s0 + $0x40] sm:$0xf] }
  0x48   :  { %v457_v13 = vmul.f32 1.442695, %v456_v9  ;;  %v464_v33 = vrot.slane %v1307_v10, 2  ;;  %v268_v62 = vmul.f32 %v1322_v27, %v260_v17  ;;  %920 = vpow2.f32 %v379_v50  ;;  %1767 = vst [vmem:[#allocation19_spill] sm:$0xff] %v1330_v8 }
  0x49   :  { %v194_v25 = vadd.f32 %v190_v59, %v168_v21  ;;  %v199_v40 = vadd.f32 %v1296_v63, %v173_v29  ;;  %v1332_v59 = vpop.eup %912  ;;  %922 = vpow2.f32 %v405_v19  ;;  %v483_v35 = vmul.f32 1.442695, %v482_v31 }
  0x4a   :  { %1768 = vst [vmem:[#allocation20_spill] sm:$0xff] %v1332_v59  ;;  %v490_v14 = vrot.slane %v1318_v11, 2  ;;  %v534_v44 = vsub.f32 %v1091_v37, %v1178_v2  ;;  %v1337_v9 = vpop.eup %914  ;;  %v294_v50 = vmul.f32 %v1332_v59, %v1249_v0  ;;  %v509_v29 = vmul.f32 1.442695, %v508_v26 }
  0x4b   :  { %v220_v54 = vadd.f32 %v216_v18, %v194_v25  ;;  %v225_v58 = vadd.f32 %v1309_v30, %v199_v40  ;;  %1769 = vst [vmem:[#allocation21_spill] sm:$0xff] %v1337_v9  ;;  %v1345_v18 = vld [vmem:[%s1683_s0 + $0x44] sm:$0xf]  ;;  %v1347_v19 = vpop.eup %916  ;;  %924 = vpow2.f32 %v431_v32  ;;  %v468_v31 = vperm.slane %v464_v33, 0  ;;  %v1361_v33 = vld [vmem:[%s1683_s0 + $0x48] sm:$0xf] }
  0x4c   :  { %1770 = vst [vmem:[#allocation22_spill] sm:$0xff] %v1345_v18  ;;  %v516_v37 = vrot.slane %v1330_v8, 2  ;;  %v560_v25 = vsub.f32 %v1097_v39, %v1178_v2  ;;  %v320_v0 = vmul.f32 %v1337_v9, %v1251_v12  ;;  %926 = vpow2.f32 %v457_v13  ;;  %v1355_v26 = vpop.eup %918 }
  0x4d   :  { %v246_v21 = vadd.f32 %v242_v42, %v220_v54  ;;  %v251_v17 = vadd.f32 %v1322_v27, %v225_v58  ;;  %1771 = vst [vmem:[#allocation23_spill] sm:$0xff] %v1347_v19  ;;  %928 = vpow2.f32 %v483_v35  ;;  %v494_v54 = vperm.slane %v490_v14, 0 }
  0x4e   :  { %1772 = vst [vmem:[#allocation24_spill] sm:$0xff] %v1355_v26  ;;  %v535_v58 = vmul.f32 1.442695, %v534_v44  ;;  %v542_v32 = vrot.slane %v1345_v18, 2  ;;  %v1363_v39 = vpop.eup %920  ;;  %v346_v12 = vmul.f32 %v1347_v19, %v1264_v28  ;;  %930 = vpow2.f32 %v509_v29 }
  0x4f   :  { %v272_v40 = vadd.f32 %v268_v62, %v246_v21  ;;  %v277_v42 = vadd.f32 %v1332_v59, %v251_v17  ;;  %1773 = vst [vmem:[#allocation25_spill] sm:$0xff] %v1361_v33  ;;  %v1368_v13 = vpop.eup %922  ;;  %v372_v35 = vmul.f32 %v1355_v26, %v1270_v34  ;;  %v520_v14 = vperm.slane %v516_v37, 0  ;;  %v1386_v34 = vld [vmem:[%s1683_s0 + $0x50] sm:$0xf] }
  0x50   :  { %1774 = vst [vmem:[#allocation26_spill] sm:$0xff] %v1363_v39  ;;  %v561_v44 = vmul.f32 1.442695, %v560_v25  ;;  %v586_v17 = vsub.f32 %v1103_v41, %v1178_v2  ;;  %v398_v28 = vmul.f32 %v1363_v39, %v1294_v60  ;;  %v568_v29 = vrot.slane %v1361_v33, 2 }
  0x51   :  { %v298_v62 = vadd.f32 %v294_v50, %v272_v40  ;;  %v303_v21 = vadd.f32 %v1337_v9, %v277_v42  ;;  %v1377_v50 = vld [vmem:[%s1683_s0 + $0x4c] sm:$0xf]  ;;  %1776 = vst [vmem:[#allocation28_spill] sm:$0xff] %v1386_v34  ;;  %v1388_v37 = vpop.eup %924  ;;  %v424_v41 = vmul.f32 %v1368_v13, %v416_v16  ;;  %932 = vpow2.f32 %v535_v58 }
  0x52   :  { %1775 = vst [vmem:[#allocation27_spill] sm:$0xff] %v1377_v50  ;;  %v546_v25 = vperm.slane %v542_v32, 0  ;;  %v450_v33 = vmul.f32 %v1388_v37, %v442_v7  ;;  %v594_v18 = vrot.slane %v1377_v50, 2  ;;  %934 = vpow2.f32 %v561_v44 }
  0x53   :  { %v324_v40 = vadd.f32 %v320_v0, %v298_v62  ;;  %v329_v42 = vadd.f32 %v1347_v19, %v303_v21  ;;  %v612_v0 = vsub.f32 %v1109_v43, %v1178_v2  ;;  %v1393_v62 = vpop.eup %926  ;;  %v587_v11 = vmul.f32 1.442695, %v586_v17  ;;  %v1406_v43 = vld [vmem:[%s1683_s0 + $0x54] sm:$0xf]  ;;  %v1416_v17 = vld [vmem:[%s1683_s0 + $0x58] sm:$0xf] }
  0x54   :  { %v1398_v8 = vpop.eup %928  ;;  %v620_v16 = vrot.slane %v1386_v34, 2  ;;  %v638_v58 = vsub.f32 %v1115_v45, %v1178_v2  ;;  %1777 = vst [vmem:[#allocation29_spill] sm:$0xff] %v1406_v43  ;;  %v664_v44 = vsub.f32 %v1121_v47, %v1178_v2  ;;  %v476_v45 = vmul.f32 %v1393_v62, %v468_v31  ;;  %v1426_v47 = vld [vmem:[%s1683_s0 + $0x5c] sm:$0xf] }
  0x55   :  { %v350_v21 = vadd.f32 %v346_v12, %v324_v40  ;;  %v355_v60 = vadd.f32 %v1355_v26, %v329_v42  ;;  %v1408_v32 = vpop.eup %930  ;;  %v572_v40 = vperm.slane %v568_v29, 0  ;;  %1779 = vst [vmem:[#allocation31_spill] sm:$0xff] %v1416_v17  ;;  %v502_v42 = vmul.f32 %v1398_v8, %v494_v54 }
  0x56   :  { %1778 = vst [vmem:[#allocation30_spill] sm:$0xff] %v1408_v32  ;;  %v528_v34 = vmul.f32 %v1408_v32, %v520_v14  ;;  %v613_v50 = vmul.f32 1.442695, %v612_v0  ;;  %v646_v29 = vrot.slane %v1406_v43, 2  ;;  %936 = vpow2.f32 %v587_v11 }
  0x57   :  { %v376_v12 = vadd.f32 %v372_v35, %v350_v21  ;;  %v381_v7 = vadd.f32 %v1363_v39, %v355_v60  ;;  %v598_v21 = vperm.slane %v594_v18, 0  ;;  %1780 = vst [vmem:[#allocation32_spill] sm:$0xff] %v1426_v47  ;;  %v1428_v60 = vpop.eup %932  ;;  %v624_v31 = vperm.slane %v620_v16, 0 }
  0x58   :  { %1781 = vst [vmem:[#allocation33_spill] sm:$0xff] %v1428_v60  ;;  %v639_v39 = vmul.f32 1.442695, %v638_v58  ;;  %v672_v54 = vrot.slane %v1416_v17, 2  ;;  %v665_v0 = vmul.f32 1.442695, %v664_v44  ;;  %v690_v18 = vsub.f32 %v1127_v49, %v1178_v2 }
  0x59   :  { %v402_v10 = vadd.f32 %v398_v28, %v376_v12  ;;  %v407_v35 = vadd.f32 %v1368_v13, %v381_v7  ;;  %v1434_v12 = vpop.eup %934  ;;  %v554_v7 = vmul.f32 %v1428_v60, %v546_v25  ;;  %938 = vpow2.f32 %v613_v50  ;;  %v1445_v49 = vld [vmem:[%s1683_s0 + $0x60] sm:$0xf] }
  0x5a   :  { %v698_v43 = vrot.slane %v1426_v47, 2  ;;  %v716_v11 = vsub.f32 %v1133_v51, %v1178_v2  ;;  %1782 = vst [vmem:[#allocation34_spill] sm:$0xff] %v1445_v49  ;;  %940 = vpow2.f32 %v639_v39  ;;  %v676_v44 = vperm.slane %v672_v54, 0 }
  0x5b   :  { %v428_v14 = vadd.f32 %v424_v41, %v402_v10  ;;  %v433_v28 = vadd.f32 %v1388_v37, %v407_v35  ;;  %v580_v10 = vmul.f32 %v1434_v12, %v572_v40  ;;  %v650_v41 = vperm.slane %v646_v29, 0 }
  0x5c   :  { %v1783_v50 = vperm.slane %v1138_v52, 0  ;;  %v128_v35 = vperm.slane %v1143_v53, 0  ;;  %942 = vpow2.f32 %v665_v0  ;;  %v1452_v40 = vpop.eup %936  ;;  %v702_v29 = vperm.slane %v698_v43, 0 }
  0x5d   :  { %v454_v16 = vadd.f32 %v450_v33, %v428_v14  ;;  %v459_v58 = vadd.f32 %v1393_v62, %v433_v28  ;;  %v691_v14 = vmul.f32 1.442695, %v690_v18  ;;  %v717_v28 = vmul.f32 1.442695, %v716_v11 }
  0x5e   :  { %v110_v25 = vmul.f32 %v1262_v22, %v1783_v50  ;;  %v724_v47 = vrot.slane %v1445_v49, 2  ;;  %v136_v39 = vmul.f32 %v1267_v23, %v128_v35  ;;  %v154_v50 = vperm.slane %v1149_v55, 0  ;;  %v1484_v49 = vld [vmem:[%s1683_s0 + $0x64] sm:$0xf] }
  0x5f   :  { %v480_v51 = vadd.f32 %v476_v45, %v454_v16  ;;  %v485_v33 = vadd.f32 %v1398_v8, %v459_v58  ;;  %v180_v22 = vperm.slane %v1154_v56, 0  ;;  %v1459_v45 = vpop.eup %938  ;;  %v606_v0 = vmul.f32 %v1452_v40, %v598_v21  ;;  %1786 = vst [vmem:[#allocation37_spill] sm:$0xff] %v1484_v49 }
  0x60   :  { %v742_v18 = vsub.f32 %v1159_v57, %v1178_v2  ;;  %v140_v43 = vadd.f32 %v136_v39, %v110_v25  ;;  %v206_v11 = vperm.slane %v1175_v1, 0  ;;  %944 = vpow2.f32 %v691_v14  ;;  %v1467_v35 = vpop.eup %940 }
  0x61   :  { %v506_v54 = vadd.f32 %v502_v42, %v480_v51  ;;  %v511_v17 = vadd.f32 %v1408_v32, %v485_v33  ;;  %v162_v42 = vmul.f32 %v1274_v36, %v154_v50  ;;  %1784 = vst [vmem:[#allocation35_spill] sm:$0xff] %v1467_v35  ;;  %v768_v51 = vsub.f32 %v1167_v61, %v1178_v2 }
  0x62   :  { %v188_v33 = vmul.f32 %v1285_v48, %v180_v22  ;;  %v232_v21 = vperm.slane %v1197_v24, 0  ;;  %v258_v57 = vperm.slane %v1204_v3, 0  ;;  %v1474_v25 = vpop.eup %942  ;;  %v214_v14 = vmul.f32 %v1296_v63, %v206_v11 }
  0x63   :  { %v532_v16 = vadd.f32 %v528_v34, %v506_v54  ;;  %v537_v58 = vadd.f32 %v1428_v60, %v511_v17  ;;  %1785 = vst [vmem:[#allocation36_spill] sm:$0xff] %v1474_v25  ;;  %v166_v17 = vadd.f32 %v162_v42, %v140_v43  ;;  %v632_v54 = vmul.f32 %v1459_v45, %v624_v31  ;;  %v1495_v42 = vld [vmem:[%s1683_s0 + $0x68] sm:$0xf] }
  0x64   :  { %946 = vpow2.f32 %v717_v28  ;;  %v743_v50 = vmul.f32 1.442695, %v742_v18  ;;  %v240_v61 = vmul.f32 %v1309_v30, %v232_v21  ;;  %v658_v43 = vmul.f32 %v1467_v35, %v650_v41  ;;  %1788 = vst [vmem:[#allocation39_spill] sm:$0xff] %v1495_v42 }
  0x65   :  { %v558_v39 = vadd.f32 %v554_v7, %v532_v16  ;;  %v563_v34 = vadd.f32 %v1434_v12, %v537_v58  ;;  %v192_v7 = vadd.f32 %v188_v33, %v166_v17  ;;  %v284_v16 = vperm.slane %v1209_v4, 0 }
  0x66   :  { %v728_v11 = vperm.slane %v724_v47, 0  ;;  %v769_v58 = vmul.f32 1.442695, %v768_v51  ;;  %v266_v31 = vmul.f32 %v1322_v27, %v258_v57  ;;  %v1489_v28 = vpop.eup %944  ;;  %v310_v33 = vperm.slane %v1214_v5, 0 }
  0x67   :  { %v584_v2 = vadd.f32 %v580_v10, %v558_v39  ;;  %v589_v22 = vadd.f32 %v1452_v40, %v563_v34  ;;  %1787 = vst [vmem:[#allocation38_spill] sm:$0xff] %v1489_v28  ;;  %v218_v21 = vadd.f32 %v214_v14, %v192_v7  ;;  %v684_v39 = vmul.f32 %v1474_v25, %v676_v44 }
  0x68   :  { %948 = vpow2.f32 %v743_v50  ;;  %v750_v47 = vrot.slane %v1484_v49, 2  ;;  %v336_v41 = vperm.slane %v1224_v38, 0  ;;  %v292_v34 = vmul.f32 %v1332_v59, %v284_v16 }
  0x69   :  { %v610_v18 = vadd.f32 %v606_v0, %v584_v2  ;;  %v615_v10 = vadd.f32 %v1459_v45, %v589_v22  ;;  %v244_v57 = vadd.f32 %v240_v61, %v218_v21  ;;  %v710_v2 = vmul.f32 %v1489_v28, %v702_v29 }
  0x6a   :  { %v1503_v17 = vpop.eup %946  ;;  %950 = vpow2.f32 %v769_v58  ;;  %v776_v14 = vrot.slane %v1495_v42, 2  ;;  %v362_v44 = vperm.slane %v1232_v46, 0  ;;  %v754_v61 = vperm.slane %v750_v47, 0 }
  0x6b   :  { %v636_v51 = vadd.f32 %v632_v54, %v610_v18  ;;  %v641_v0 = vadd.f32 %v1467_v35, %v615_v10  ;;  %1789 = vst [vmem:[#allocation40_spill] sm:$0xff] %v1503_v17  ;;  %v270_v7 = vadd.f32 %v266_v31, %v244_v57  ;;  %v318_v54 = vmul.f32 %v1337_v9, %v310_v33 }
  0x6c   :  { %v736_v18 = vmul.f32 %v1503_v17, %v728_v11  ;;  %v388_v16 = vperm.slane %v1247_v15, 0  ;;  %v344_v58 = vmul.f32 %v1347_v19, %v336_v41  ;;  %v780_v49 = vperm.slane %v776_v14, 0  ;;  %v1791_v41 = vld [vmem:[#allocation18_spill] sm:$0xff] }
  0x6d   :  { %v662_v50 = vadd.f32 %v658_v43, %v636_v51  ;;  %v667_v22 = vadd.f32 %v1474_v25, %v641_v0  ;;  %v296_v29 = vadd.f32 %v292_v34, %v270_v7  ;;  %v370_v43 = vmul.f32 %v1355_v26, %v362_v44  ;;  %v1790_v0 = vld [vmem:[#allocation17_spill] sm:$0xff] }
  0x6e   :  { %v1514_v42 = vpop.eup %948  ;;  %v414_v31 = vperm.slane %v1260_v20, 0  ;;  %v440_v33 = vperm.slane %v1283_v6, 0 }
  0x6f   :  { %v688_v10 = vadd.f32 %v684_v39, %v662_v50  ;;  %v693_v21 = vadd.f32 %v1489_v28, %v667_v22  ;;  %v322_v47 = vadd.f32 %v318_v54, %v296_v29  ;;  %v466_v39 = vperm.slane %v1790_v0, 0  ;;  %v1792_v22 = vld [vmem:[#allocation19_spill] sm:$0xff]  ;;  %v1793_v28 = vld [vmem:[#allocation26_spill] sm:$0xff] }
  0x70   :  { %v1521_v57 = vpop.eup %950  ;;  %v762_v34 = vmul.f32 %v1514_v42, %v754_v61  ;;  %v492_v50 = vperm.slane %v1791_v41, 0  ;;  %v518_v14 = vperm.slane %v1792_v22, 0  ;;  %v396_v19 = vmul.f32 %v1793_v28, %v388_v16 }
  0x71   :  { %v714_v51 = vadd.f32 %v710_v2, %v688_v10  ;;  %v719_v11 = vadd.f32 %v1503_v17, %v693_v21  ;;  %v348_v26 = vadd.f32 %v344_v58, %v322_v47  ;;  %v788_v2 = vmul.f32 %v1521_v57, %v780_v49 }
  0x72   :  { %v422_v54 = vmul.f32 %v1368_v13, %v414_v31  ;;  %v448_v29 = vmul.f32 %v1388_v37, %v440_v33  ;;  %v474_v61 = vmul.f32 %v1393_v62, %v466_v39  ;;  %v500_v22 = vmul.f32 %v1398_v8, %v492_v50  ;;  %v1795_v39 = vld [vmem:[#allocation25_spill] sm:$0xff] }
  0x73   :  { %v740_v7 = vadd.f32 %v736_v18, %v714_v51  ;;  %v745_v44 = vadd.f32 %v1514_v42, %v719_v11  ;;  %v374_v21 = vadd.f32 %v370_v43, %v348_v26  ;;  %v526_v18 = vmul.f32 %v1408_v32, %v518_v14  ;;  %v1794_v51 = vld [vmem:[#allocation22_spill] sm:$0xff] }
  0x74   :  { %v101_v58 = vrot.slane %v1138_v52, 3  ;;  %v544_v49 = vperm.slane %v1794_v51, 0  ;;  %v127_v31 = vrot.slane %v1143_v53, 3  ;;  %v153_v26 = vrot.slane %v1149_v55, 3 }
  0x75   :  { %v771_v10 = vadd.f32 %v1521_v57, %v745_v44  ;;  %v766_v17 = vadd.f32 %v762_v34, %v740_v7  ;;  %v400_v16 = vadd.f32 %v396_v19, %v374_v21  ;;  %v179_v43 = vrot.slane %v1154_v56, 3  ;;  %v1796_v44 = vld [vmem:[#allocation13_spill] sm:$0xff] }
  0x76   :  { %v105_v11 = vperm.slane %v101_v58, 0  ;;  %v205_v33 = vrot.slane %v1175_v1, 3  ;;  %v570_v34 = vperm.slane %v1795_v39, 0  ;;  %v131_v50 = vperm.slane %v127_v31, 0  ;;  %v1797_v1 = vld [vmem:[#allocation27_spill] sm:$0xff] }
  0x77   :  { %952 = vrcp.f32 %v771_v10  ;;  %v426_v47 = vadd.f32 %v422_v54, %v400_v16  ;;  %v231_v14 = vrot.slane %v1197_v24, 3  ;;  %v792_v7 = vadd.f32 %v788_v2, %v766_v17 }
  0x78   :  { %v113_v19 = vmul.f32 %v1796_v44, %v105_v11  ;;  %v157_v10 = vperm.slane %v153_v26, 0  ;;  %v183_v21 = vperm.slane %v179_v43, 0  ;;  %v139_v58 = vmul.f32 %v1267_v23, %v131_v50  ;;  %v1799_v43 = vld [vmem:[#allocation28_spill] sm:$0xff] }
  0x79   :  { %v452_v52 = vadd.f32 %v448_v29, %v426_v47  ;;  %v209_v53 = vperm.slane %v205_v33, 0  ;;  %v257_v55 = vrot.slane %v1204_v3, 3  ;;  %v552_v56 = vmul.f32 %v1428_v60, %v544_v49  ;;  %v1800_v47 = vld [vmem:[#allocation29_spill] sm:$0xff]  ;;  %v821_v3 = vpop.permute.xlu1 %820 }
  0x7a   :  { %v596_v54 = vperm.slane %v1797_v1, 0  ;;  %v165_v16 = vmul.f32 %v1274_v36, %v157_v10  ;;  %v235_v31 = vperm.slane %v231_v14, 0  ;;  %v143_v2 = vadd.f32 %v139_v58, %v113_v19  ;;  %v1801_v19 = vld [vmem:[#allocation31_spill] sm:$0xff] }
  0x7b   :  { %v478_v17 = vadd.f32 %v474_v61, %v452_v52  ;;  %v191_v11 = vmul.f32 %v1285_v48, %v183_v21  ;;  %v283_v29 = vrot.slane %v1209_v4, 3  ;;  %v622_v33 = vperm.slane %v1799_v43, 0 }
  0x7c   :  { %v648_v50 = vperm.slane %v1800_v47, 0  ;;  %v309_v49 = vrot.slane %v1214_v5, 3  ;;  %v169_v10 = vadd.f32 %v165_v16, %v143_v2  ;;  %v217_v14 = vmul.f32 %v1296_v63, %v209_v53 }
  0x7d   :  { %v1549_v32 = vpop.eup %952  ;;  %v504_v24 = vadd.f32 %v500_v22, %v478_v17  ;;  %v261_v36 = vperm.slane %v257_v55, 0  ;;  %v578_v61 = vmul.f32 %v1434_v12, %v570_v34  ;;  %v674_v21 = vperm.slane %v1801_v19, 0  ;;  %v1802_v17 = vld [vmem:[#allocation32_spill] sm:$0xff] }
  0x7e   :  { %1798 = vst [vmem:[#allocation26_spill] sm:$0xff] %v1549_v32  ;;  %v797_v26 = vmul.f32 %v1549_v32, %v792_v7  ;;  %v243_v58 = vmul.f32 %v1309_v30, %v235_v31  ;;  %v195_v48 = vadd.f32 %v191_v11, %v169_v10  ;;  %v287_v4 = vperm.slane %v283_v29, 0  ;;  %v1803_v10 = vld [vmem:[#allocation34_spill] sm:$0xff] }
  0x7f   :  { %v530_v7 = vadd.f32 %v526_v18, %v504_v24  ;;  %v335_v32 = vrot.slane %v1224_v38, 3  ;;  %v604_v22 = vmul.f32 %v1452_v40, %v596_v54  ;;  %v313_v53 = vperm.slane %v309_v49, 0 }
  0x80   :  { %v829_v52 = vadd.f32 %v821_v3, %v797_v26  ;;  %v361_v55 = vrot.slane %v1232_v46, 3  ;;  %v630_v34 = vmul.f32 %v1459_v45, %v622_v33  ;;  %v221_v16 = vadd.f32 %v217_v14, %v195_v48 }
  0x81   :  { %v556_v3 = vadd.f32 %v552_v56, %v530_v7  ;;  %v269_v31 = vmul.f32 %v1322_v27, %v261_v36  ;;  %v656_v24 = vmul.f32 %v1467_v35, %v648_v50  ;;  %v682_v18 = vmul.f32 %v1474_v25, %v674_v21  ;;  %v1804_v7 = vld [vmem:[#allocation37_spill] sm:$0xff] }
  0x82   :  { %833 = vst [vmem:[%s1684_s3 + $0x10] sm:$0xff] %v829_v52  ;;  %v700_v2 = vperm.slane %v1802_v17, 0  ;;  %v387_v11 = vrot.slane %v1247_v15, 3  ;;  %v247_v26 = vadd.f32 %v243_v58, %v221_v16  ;;  %v295_v54 = vmul.f32 %v1332_v59, %v287_v4  ;;  %v1805_v58 = vld [vmem:[#allocation19_spill] sm:$0xff]  ;;  %v1810_v59 = vld [vmem:[#allocation40_spill] sm:$0xff] }
  0x83   :  { %v582_v29 = vadd.f32 %v578_v61, %v556_v3  ;;  %v339_v49 = vperm.slane %v335_v32, 0  ;;  %v726_v56 = vperm.slane %v1803_v10, 0  ;;  %v321_v33 = vmul.f32 %v1337_v9, %v313_v53  ;;  %v1806_v53 = vld [vmem:[#allocation23_spill] sm:$0xff] }
  0x84   :  { %v365_v48 = vperm.slane %v361_v55, 0  ;;  %v413_v36 = vrot.slane %v1260_v20, 3  ;;  %v273_v50 = vadd.f32 %v269_v31, %v247_v26  ;;  %v439_v52 = vrot.slane %v1283_v6, 3  ;;  %v1807_v20 = vld [vmem:[#allocation38_spill] sm:$0xff]  ;;  %v1808_v31 = vld [vmem:[#allocation39_spill] sm:$0xff]  ;;  %v1809_v26 = vld [vmem:[#allocation24_spill] sm:$0xff] }
  0x85   :  { %v608_v14 = vadd.f32 %v604_v22, %v582_v29  ;;  %v465_v21 = vrot.slane %v1790_v0, 3  ;;  %v752_v25 = vperm.slane %v1804_v7, 0  ;;  %v491_v61 = vrot.slane %v1791_v41, 3 }
  0x86   :  { %v517_v4 = vrot.slane %v1805_v58, 3  ;;  %v543_v32 = vrot.slane %v1794_v51, 3  ;;  %v299_v16 = vadd.f32 %v295_v54, %v273_v50  ;;  %v347_v55 = vmul.f32 %v1806_v53, %v339_v49 }
  0x87   :  { %v634_v3 = vadd.f32 %v630_v34, %v608_v14  ;;  %v391_v9 = vperm.slane %v387_v11, 0  ;;  %v708_v22 = vmul.f32 %v1807_v20, %v700_v2  ;;  %v778_v29 = vperm.slane %v1808_v31, 0 }
  0x88   :  { %v373_v6 = vmul.f32 %v1809_v26, %v365_v48  ;;  %v417_v0 = vperm.slane %v413_v36, 0  ;;  %v325_v7 = vadd.f32 %v321_v33, %v299_v16  ;;  %v443_v15 = vperm.slane %v439_v52, 0 }
  0x89   :  { %v660_v35 = vadd.f32 %v656_v24, %v634_v3  ;;  %v469_v41 = vperm.slane %v465_v21, 0  ;;  %v734_v58 = vmul.f32 %v1810_v59, %v726_v56  ;;  %v495_v10 = vperm.slane %v491_v61, 0  ;;  %v1812_v21 = vld [vmem:[#allocation3_spill] sm:$0xff]  ;;  %v1814_v3 = vld [vmem:[#allocation5_spill] sm:$0xff] }
  0x8a   :  { %v521_v51 = vperm.slane %v517_v4, 0  ;;  %v547_v34 = vperm.slane %v543_v32, 0  ;;  %v760_v49 = vmul.f32 %v1514_v42, %v752_v25  ;;  %v351_v11 = vadd.f32 %v347_v55, %v325_v7  ;;  %v1811_v25 = vld [vmem:[#allocation30_spill] sm:$0xff]  ;;  %v1813_v4 = vld [vmem:[#allocation4_spill] sm:$0xff] }
  0x8b   :  { %v686_v54 = vadd.f32 %v682_v18, %v660_v35  ;;  %v399_v2 = vmul.f32 %v1793_v28, %v391_v9  ;;  %v786_v14 = vmul.f32 %v1521_v57, %v778_v29  ;;  %v425_v48 = vmul.f32 %v1368_v13, %v417_v0 }
  0x8c   :  { %v569_v24 = vrot.slane %v1795_v39, 3  ;;  %v595_v33 = vrot.slane %v1797_v1, 3  ;;  %v377_v50 = vadd.f32 %v373_v6, %v351_v11  ;;  %v451_v56 = vmul.f32 %v1388_v37, %v443_v15  ;;  %v1815_v11 = vld [vmem:[#allocation6_spill] sm:$0xff] }
  0x8d   :  { %v712_v36 = vadd.f32 %v708_v22, %v686_v54  ;;  %v477_v52 = vmul.f32 %v1393_v62, %v469_v41  ;;  %v503_v35 = vmul.f32 %v1398_v8, %v495_v10  ;;  %v529_v18 = vmul.f32 %v1811_v25, %v521_v51 }
  0x8e   :  { %v555_v9 = vmul.f32 %v1428_v60, %v547_v34  ;;  %v99_v7 = vrot.slane %v1812_v21, 1  ;;  %v403_v0 = vadd.f32 %v399_v2, %v377_v50  ;;  %v125_v32 = vrot.slane %v1813_v4, 1  ;;  %v1816_v2 = vld [vmem:[#allocation7_spill] sm:$0xff]  ;;  %v813_v60 = vpop.permute.xlu0 %812 }
  0x8f   :  { %v738_v61 = vadd.f32 %v734_v58, %v712_v36  ;;  %v151_v16 = vrot.slane %v1814_v3, 1  ;;  %v573_v55 = vperm.slane %v569_v24, 0  ;;  %v599_v6 = vperm.slane %v595_v33, 0  ;;  %v1817_v33 = vld [vmem:[#allocation14_spill] sm:$0xff] }
  0x90   :  { %v621_v15 = vrot.slane %v1799_v43, 3  ;;  %v103_v22 = vperm.slane %v99_v7, 0  ;;  %v429_v29 = vadd.f32 %v425_v48, %v403_v0  ;;  %v129_v10 = vperm.slane %v125_v32, 0  ;;  %v1820_v32 = vld [vmem:[#allocation26_spill] sm:$0xff] }
  0x91   :  { %v764_v41 = vadd.f32 %v760_v49, %v738_v61  ;;  %v155_v54 = vperm.slane %v151_v16, 0  ;;  %v647_v51 = vrot.slane %v1800_v47, 3  ;;  %v177_v58 = vrot.slane %v1815_v11, 1  ;;  %v1818_v49 = vld [vmem:[#allocation8_spill] sm:$0xff]  ;;  %v1819_v61 = vld [vmem:[#allocation9_spill] sm:$0xff] }
  0x92   :  { %v111_v34 = vmul.f32 %v1796_v44, %v103_v22  ;;  %v203_v36 = vrot.slane %v1816_v2, 1  ;;  %v455_v21 = vadd.f32 %v451_v56, %v429_v29  ;;  %v137_v24 = vmul.f32 %v1267_v23, %v129_v10  ;;  %v1821_v22 = vld [vmem:[#allocation10_spill] sm:$0xff]  ;;  %v1822_v56 = vld [vmem:[#allocation16_spill] sm:$0xff] }
  0x93   :  { %v790_v50 = vadd.f32 %v786_v14, %v764_v41  ;;  %v163_v4 = vmul.f32 %v1817_v33, %v155_v54  ;;  %v181_v3 = vperm.slane %v177_v58, 0  ;;  %v229_v48 = vrot.slane %v1818_v49, 1  ;;  %v1823_v49 = vld [vmem:[#allocation34_spill] sm:$0xff] }
  0x94   :  { %v207_v7 = vperm.slane %v203_v36, 0  ;;  %v255_v0 = vrot.slane %v1819_v61, 1  ;;  %v481_v47 = vadd.f32 %v477_v52, %v455_v21  ;;  %v141_v44 = vadd.f32 %v137_v24, %v111_v34 }
  0x95   :  { %v795_v16 = vmul.f32 %v1820_v32, %v790_v50  ;;  %v281_v11 = vrot.slane %v1821_v22, 1  ;;  %v673_v14 = vrot.slane %v1801_v19, 3  ;;  %v189_v41 = vmul.f32 %v1822_v56, %v181_v3  ;;  %v1828_v56 = vld [vmem:[#allocation12_spill] sm:$0xff] }
  0x96   :  { %v233_v23 = vperm.slane %v229_v48, 0  ;;  %v259_v29 = vperm.slane %v255_v0, 0  ;;  %v507_v54 = vadd.f32 %v503_v35, %v481_v47  ;;  %v167_v58 = vadd.f32 %v163_v4, %v141_v44  ;;  %v1826_v44 = vld [vmem:[#allocation35_spill] sm:$0xff] }
  0x97   :  { %v827_v10 = vadd.f32 %v813_v60, %v795_v16  ;;  %v215_v2 = vmul.f32 %v1296_v63, %v207_v7  ;;  %v581_v36 = vmul.f32 %v1434_v12, %v573_v55  ;;  %v625_v33 = vperm.slane %v621_v15, 0 }
  0x98   :  { %v285_v50 = vperm.slane %v281_v11, 0  ;;  %v307_v52 = vrot.slane %v1214_v5, 1  ;;  %v533_v34 = vadd.f32 %v529_v18, %v507_v54  ;;  %v193_v21 = vadd.f32 %v189_v41, %v167_v58  ;;  %v1830_v54 = vld [vmem:[#allocation36_spill] sm:$0xff] }
  0x99   :  { %831 = vst [vmem:[%s1684_s3] sm:$0xff] %v827_v10  ;;  %v241_v24 = vmul.f32 %v1309_v30, %v233_v23  ;;  %v333_v60 = vrot.slane %v1224_v38, 1  ;;  %v607_v47 = vmul.f32 %v1452_v40, %v599_v6  ;;  %v651_v35 = vperm.slane %v647_v51, 0  ;;  %v1824_v30 = vld [vmem:[#allocation20_spill] sm:$0xff]  ;;  %v1825_v51 = vld [vmem:[#allocation11_spill] sm:$0xff] }
  0x9a   :  { %v699_v63 = vrot.slane %v1802_v17, 3  ;;  %v267_v55 = vmul.f32 %v1322_v27, %v259_v29  ;;  %v559_v15 = vadd.f32 %v555_v9, %v533_v34  ;;  %v219_v4 = vadd.f32 %v215_v2, %v193_v21  ;;  %v1827_v9 = vld [vmem:[#allocation37_spill] sm:$0xff] }
  0x9b   :  { %v311_v5 = vperm.slane %v307_v52, 0  ;;  %v359_v3 = vrot.slane %v1232_v46, 1  ;;  %v633_v7 = vmul.f32 %v1459_v45, %v625_v33  ;;  %v677_v18 = vperm.slane %v673_v14, 0  ;;  %v1829_v29 = vld [vmem:[#allocation21_spill] sm:$0xff]  ;;  %v1831_v33 = vld [vmem:[#allocation15_spill] sm:$0xff] }
  0x9c   :  { %v725_v48 = vrot.slane %v1823_v49, 3  ;;  %v293_v61 = vmul.f32 %v1824_v30, %v285_v50  ;;  %v585_v38 = vadd.f32 %v581_v36, %v559_v15  ;;  %v245_v0 = vadd.f32 %v241_v24, %v219_v4  ;;  %v1832_v4 = vld [vmem:[#allocation17_spill] sm:$0xff] }
  0x9d   :  { %v337_v6 = vperm.slane %v333_v60, 0  ;;  %v385_v16 = vrot.slane %v1825_v51, 1  ;;  %v659_v22 = vmul.f32 %v1826_v44, %v651_v35  ;;  %v703_v27 = vperm.slane %v699_v63, 0 }
  0x9e   :  { %v751_v11 = vrot.slane %v1827_v9, 3  ;;  %v411_v41 = vrot.slane %v1828_v56, 1  ;;  %v611_v46 = vadd.f32 %v607_v47, %v585_v38  ;;  %v271_v23 = vadd.f32 %v267_v55, %v245_v0 }
  0x9f   :  { %v319_v14 = vmul.f32 %v1829_v29, %v311_v5  ;;  %v363_v10 = vperm.slane %v359_v3, 0  ;;  %v685_v58 = vmul.f32 %v1830_v54, %v677_v18  ;;  %v729_v2 = vperm.slane %v725_v48, 0  ;;  %v1835_v29 = vld [vmem:[#allocation22_spill] sm:$0xff] }
  0xa0   :  { %v777_v36 = vrot.slane %v1808_v31, 3  ;;  %v437_v50 = vrot.slane %v1831_v33, 1  ;;  %v637_v52 = vadd.f32 %v633_v7, %v611_v46  ;;  %v297_v34 = vadd.f32 %v293_v61, %v271_v23 }
  0xa1   :  { %v345_v21 = vmul.f32 %v1806_v53, %v337_v6  ;;  %v389_v24 = vperm.slane %v385_v16, 0  ;;  %v711_v60 = vmul.f32 %v1807_v20, %v703_v27  ;;  %v755_v35 = vperm.slane %v751_v11, 0  ;;  %v1833_v53 = vld [vmem:[#allocation18_spill] sm:$0xff] }
  0xa2   :  { %v415_v47 = vperm.slane %v411_v41, 0  ;;  %v663_v63 = vadd.f32 %v659_v22, %v637_v52  ;;  %v323_v55 = vadd.f32 %v319_v14, %v297_v34  ;;  %v371_v15 = vmul.f32 %v1809_v26, %v363_v10  ;;  %v1834_v26 = vld [vmem:[#allocation19_spill] sm:$0xff] }
  0xa3   :  { %v463_v5 = vrot.slane %v1832_v4, 1  ;;  %v737_v3 = vmul.f32 %v1810_v59, %v729_v2  ;;  %v781_v18 = vperm.slane %v777_v36, 0  ;;  %v441_v48 = vperm.slane %v437_v50, 0 }
  0xa4   :  { %v689_v30 = vadd.f32 %v685_v58, %v663_v63  ;;  %v349_v7 = vadd.f32 %v345_v21, %v323_v55  ;;  %v397_v61 = vmul.f32 %v1793_v28, %v389_v24  ;;  %v489_v38 = vrot.slane %v1833_v53, 1  ;;  %v1836_v55 = vld [vmem:[#allocation33_spill] sm:$0xff] }
  0xa5   :  { %v763_v0 = vmul.f32 %v1514_v42, %v755_v35  ;;  %v423_v6 = vmul.f32 %v1368_v13, %v415_v47  ;;  %v467_v22 = vperm.slane %v463_v5, 0  ;;  %v515_v27 = vrot.slane %v1834_v26, 1 }
  0xa6   :  { %v715_v51 = vadd.f32 %v711_v60, %v689_v30  ;;  %v375_v16 = vadd.f32 %v371_v15, %v349_v7  ;;  %v789_v11 = vmul.f32 %v1521_v57, %v781_v18  ;;  %v449_v56 = vmul.f32 %v1388_v37, %v441_v48  ;;  %v825_v37 = vpop.permute.xlu1 %824 }
  0xa7   :  { %v493_v23 = vperm.slane %v489_v38, 0  ;;  %v541_v28 = vrot.slane %v1835_v29, 1  ;;  %v567_v14 = vrot.slane %v1795_v39, 1  ;;  %v475_v13 = vmul.f32 %v1393_v62, %v467_v22 }
  0xa8   :  { %v741_v41 = vadd.f32 %v737_v3, %v715_v51  ;;  %v401_v46 = vadd.f32 %v397_v61, %v375_v16  ;;  %v519_v2 = vperm.slane %v515_v27, 0  ;;  %v593_v36 = vrot.slane %v1797_v1, 1  ;;  %v1837_v1 = vld [vmem:[#allocation29_spill] sm:$0xff] }
  0xa9   :  { %v501_v52 = vmul.f32 %v1398_v8, %v493_v23  ;;  %v545_v34 = vperm.slane %v541_v28, 0  ;;  %v571_v21 = vperm.slane %v567_v14, 0  ;;  %v619_v39 = vrot.slane %v1799_v43, 1 }
  0xaa   :  { %v767_v10 = vadd.f32 %v763_v0, %v741_v41  ;;  %v427_v58 = vadd.f32 %v423_v6, %v401_v46  ;;  %v527_v35 = vmul.f32 %v1811_v25, %v519_v2  ;;  %v597_v47 = vperm.slane %v593_v36, 0 }
  0xab   :  { %v553_v15 = vmul.f32 %v1836_v55, %v545_v34  ;;  %v645_v4 = vrot.slane %v1837_v1, 1  ;;  %v579_v5 = vmul.f32 %v1434_v12, %v571_v21  ;;  %v623_v3 = vperm.slane %v619_v39, 0 }
  0xac   :  { %v793_v33 = vadd.f32 %v789_v11, %v767_v10  ;;  %v453_v50 = vadd.f32 %v449_v56, %v427_v58  ;;  %v671_v18 = vrot.slane %v1801_v19, 1  ;;  %v605_v43 = vmul.f32 %v1452_v40, %v597_v47 }
  0xad   :  { %v649_v48 = vperm.slane %v645_v4, 0  ;;  %v697_v30 = vrot.slane %v1802_v17, 1  ;;  %v631_v61 = vmul.f32 %v1459_v45, %v623_v3  ;;  %v723_v38 = vrot.slane %v1823_v49, 1 }
  0xae   :  { %v798_v24 = vmul.f32 %v1820_v32, %v793_v33  ;;  %v479_v60 = vadd.f32 %v475_v13, %v453_v50  ;;  %v675_v53 = vperm.slane %v671_v18, 0  ;;  %v749_v12 = vrot.slane %v1827_v9, 1 }
  0xaf   :  { %v657_v6 = vmul.f32 %v1826_v44, %v649_v48  ;;  %v701_v51 = vperm.slane %v697_v30, 0  ;;  %v727_v22 = vperm.slane %v723_v38, 0  ;;  %v775_v40 = vrot.slane %v1808_v31, 1 }
  0xb0   :  { %v830_v63 = vadd.f32 %v825_v37, %v798_v24  ;;  %v505_v62 = vadd.f32 %v501_v52, %v479_v60  ;;  %v683_v19 = vmul.f32 %v1830_v54, %v675_v53  ;;  %v753_v27 = vperm.slane %v749_v12, 0  ;;  %v817_v54 = vpop.permute.xlu0 %816 }
  0xb1   :  { %v709_v17 = vmul.f32 %v1807_v20, %v701_v51  ;;  %v735_v11 = vmul.f32 %v1810_v59, %v727_v22  ;;  %v779_v49 = vperm.slane %v775_v40, 0 }
  0xb2   :  { %834 = vst [vmem:[%s1684_s3 + $0x18] sm:$0xff] %v830_v63  ;;  %v531_v8 = vadd.f32 %v527_v35, %v505_v62  ;;  %v761_v44 = vmul.f32 %v1514_v42, %v753_v27 }
  0xb3   :  { %v787_v9 = vmul.f32 %v1521_v57, %v779_v49 }
  0xb4   :  { %v557_v25 = vadd.f32 %v553_v15, %v531_v8 }
  0xb6   :  { %v583_v7 = vadd.f32 %v579_v5, %v557_v25 }
  0xb8   :  { %v609_v0 = vadd.f32 %v605_v43, %v583_v7 }
  0xba   :  { %v635_v16 = vadd.f32 %v631_v61, %v609_v0 }
  0xbc   :  { %v661_v26 = vadd.f32 %v657_v6, %v635_v16 }
  0xbe   :  { %v687_v45 = vadd.f32 %v683_v19, %v661_v26 }
  0xc0   :  { %v713_v56 = vadd.f32 %v709_v17, %v687_v45 }
  0xc2   :  { %v739_v41 = vadd.f32 %v735_v11, %v713_v56 }
  0xc4   :  { %v765_v46 = vadd.f32 %v761_v44, %v739_v41 }
  0xc6   :  { %v791_v23 = vadd.f32 %v787_v9, %v765_v46 }
  0xc8   :  { %v796_v29 = vmul.f32 %v1820_v32, %v791_v23 }
  0xca   :  { %v828_v31 = vadd.f32 %v817_v54, %v796_v29 }
  0xcc   :  { %832 = vst [vmem:[%s1684_s3 + $0x8] sm:$0xff] %v828_v31 }

</bundles_post_ra>
